<compile_context>
chip_gen: v7x
topology: tpu7x:2x2x1
jax: 0.10.0
libtpu: 0.0.40
codegen_flags: <defaults>
</compile_context>

<pallas_src>
import jax
import jax.numpy as jnp
from jax import lax
from jax.experimental import pallas as pl
from jax.experimental.pallas import tpu as pltpu


def self_attn_kernel(x_ref, w_ref, b_ref, gamma_ref, out_ref, attn_ref,
                     q_sc, k_sc, v_sc):
    # Grid: (batch, query-row tile).  x_ref block: [1, C, N] (resident per batch).
    r = pl.program_id(1)
    C8 = k_sc.shape[0]
    C = v_sc.shape[0]
    TQ = out_ref.shape[2]

    # ---- fused q|k|v projection, computed once per batch element -------------
    @pl.when(r == 0)
    def _():
        x_bf = x_ref[0].astype(jnp.bfloat16)                          # [C, N]
        # One 1x1-conv matmul for q|k|v: [C_tot, C] @ [C, N] -> [C_tot, N] (f32 acc).
        proj = jnp.dot(w_ref[...], x_bf,
                       preferred_element_type=jnp.float32)            # [2*C8+C, N]
        proj = proj + b_ref[...]                                      # bias [C_tot, 1]
        # q stored transposed ([N, C8]) so the energy matmul is a plain A@B.
        q_sc[...] = jnp.transpose(proj[0:C8]).astype(jnp.bfloat16)    # [N, C8]
        k_sc[...] = proj[C8:2 * C8].astype(jnp.bfloat16)              # [C8, N]
        v_sc[...] = proj[2 * C8:2 * C8 + C].astype(jnp.bfloat16)      # [C, N]

    # ---- one tile of query rows ----------------------------------------------
    col = pl.multiple_of(r * TQ, TQ)
    q_blk = q_sc[pl.ds(col, TQ), :]                                   # [TQ, C8] bf16

    # energy[i, j] = <q_i, k_j>   (f32 accumulation on the MXU)
    energy = jnp.dot(q_blk, k_sc[...],
                     preferred_element_type=jnp.float32)              # [TQ, N]

    # Numerically-stable row softmax (f32); EUP reciprocal instead of VALU divide.
    m = jnp.max(energy, axis=-1, keepdims=True)
    p = jnp.exp(energy - m)
    inv = pl.reciprocal(jnp.sum(p, axis=-1, keepdims=True), approx=True)
    attn = p * inv                                                    # [TQ, N] f32

    # out = v @ attn^T -> [C, TQ]; gamma * out + x (residual in f32).
    o = lax.dot_general(v_sc[...], attn.astype(jnp.bfloat16),
                        (((1,), (1,)), ((), ())),
                        preferred_element_type=jnp.float32)           # [C, TQ]
    x_blk = x_ref[0, :, pl.ds(col, TQ)].astype(jnp.float32)           # [C, TQ]
    out_ref[0] = (gamma_ref[0] * o + x_blk).astype(out_ref.dtype)
    attn_ref[0] = attn.astype(attn_ref.dtype)


def _pick_tq(N, attn_bytes):
    """Largest query-row tile in {512, 256, 128} dividing N whose per-step
    footprint (double-buffered attn block + softmax temporaries) fits ~24 MiB
    (v7x-safe). Falls back to the full N for odd/small spatial sizes."""
    cands = [t for t in (512, 256, 128) if N % t == 0]
    if not cands:
        return N
    for tq in cands:
        if 2 * tq * N * attn_bytes + 3 * tq * N * 4 <= 24 * 2 ** 20:
            return tq
    return cands[-1]


def self_attn_forward(x_nchw, params, *, attn_dtype=jnp.float32):
    """x_nchw: [B, C, W, H]. params: wq/bq/wk/bk/wv/bv (weights [C_in, C_out]), gamma.
    Returns (out [B,C,W,H], attention [B,N,N])."""
    B, C, W, H = x_nchw.shape
    N = W * H
    C8 = params["wq"].shape[1]
    C_tot = 2 * C8 + C

    # [B, C, N] layout throughout — no transposes, N stays on the lane axis.
    x_cn = x_nchw.reshape(B, C, N).astype(jnp.float32)

    # Fuse the three 1x1-conv weights into one [C_tot, C] bf16 matrix (+ f32 bias).
    w_all = jnp.concatenate(
        [params["wq"], params["wk"], params["wv"]], axis=1).T.astype(jnp.bfloat16)
    b_all = jnp.concatenate(
        [params["bq"], params["bk"], params["bv"]], axis=0
    ).reshape(C_tot, 1).astype(jnp.float32)
    gamma = params["gamma"].reshape(1).astype(jnp.float32)

    attn_bytes = jnp.dtype(attn_dtype).itemsize
    TQ = _pick_tq(N, attn_bytes)
    grid = (B, N // TQ)

    # Rough VMEM budget (double-buffered blocks + scratch + in-kernel temporaries).
    lane = 128
    vmem_need = (
        2 * C * N * 4                               # x block
        + 2 * C_tot * max(C, lane) * 2              # fused weights
        + 2 * C_tot * lane * 4                      # bias
        + 2 * C * TQ * 4                            # out block
        + 2 * TQ * N * attn_bytes                   # attn block
        + N * lane * 2 + 16 * N * 2 + C * N * 2     # q/k/v scratch (padded)
        + C_tot * N * 4 + 3 * TQ * N * 4 + C * N * 2)  # proj / softmax temporaries
    vmem_limit = int(min(64 * 2 ** 20, max(32 * 2 ** 20, int(vmem_need * 1.4))))

    flops = B * (2 * N * C * C_tot + 2 * N * N * C8 + 2 * N * N * C)
    bytes_accessed = int(2 * B * C * N * 4 + C * C_tot * 2 + C_tot * 4
                         + B * N * N * attn_bytes)

    def resident(shape):
        return pl.BlockSpec(shape, lambda b, r: (0, 0))

    out_cn, attn = pl.pallas_call(
        self_attn_kernel,
        out_shape=(jax.ShapeDtypeStruct((B, C, N), jnp.float32),
                   jax.ShapeDtypeStruct((B, N, N), attn_dtype)),
        grid_spec=pltpu.PrefetchScalarGridSpec(
            num_scalar_prefetch=0,
            grid=grid,
            in_specs=[
                pl.BlockSpec((1, C, N), lambda b, r: (b, 0, 0)),   # x (resident per batch)
                resident((C_tot, C)),                              # fused q|k|v weights
                resident((C_tot, 1)),                              # fused biases
                pl.BlockSpec(memory_space=pltpu.MemorySpace.SMEM),  # gamma scalar
            ],
            out_specs=[
                pl.BlockSpec((1, C, TQ), lambda b, r: (b, 0, r)),  # out [B, C, N]
                pl.BlockSpec((1, TQ, N), lambda b, r: (b, r, 0)),  # attention map
            ],
            scratch_shapes=[
                pltpu.VMEM((N, C8), jnp.bfloat16),                 # q (transposed)
                pltpu.VMEM((C8, N), jnp.bfloat16),                 # k
                pltpu.VMEM((C, N), jnp.bfloat16),                  # v
            ],
        ),
        compiler_params=pltpu.CompilerParams(
            dimension_semantics=("parallel", "arbitrary"),
            vmem_limit_bytes=vmem_limit),
        cost_estimate=pl.CostEstimate(
            flops=flops,
            transcendentals=B * N * N,
            bytes_accessed=bytes_accessed),
    )(x_cn, w_all, b_all, gamma)

    out = out_cn.reshape(B, C, W, H).astype(x_nchw.dtype)
    return out, attn


def init_self_attn_params(key, in_dim):
    """PyTorch Conv2d(k=1) default init: U(-1/sqrt(fan_in), 1/sqrt(fan_in)).
    Weights stored transposed as [C_in, C_out]; gamma zero-init like the module."""
    c8 = in_dim // 8
    ks = jax.random.split(key, 6)

    def conv1x1(kw, kb, c_in, c_out):
        bound = 1.0 / jnp.sqrt(jnp.float32(c_in))
        w = jax.random.uniform(kw, (c_in, c_out), jnp.float32, -bound, bound)
        b = jax.random.uniform(kb, (c_out,), jnp.float32, -bound, bound)
        return w, b

    wq, bq = conv1x1(ks[0], ks[1], in_dim, c8)
    wk, bk = conv1x1(ks[2], ks[3], in_dim, c8)
    wv, bv = conv1x1(ks[4], ks[5], in_dim, in_dim)
    gamma = jnp.zeros((1,), jnp.float32)
    return dict(wq=wq, bq=bq, wk=wk, bk=bk, wv=wv, bv=bv, gamma=gamma)


def self_attn_reference(x_nchw, p):
    """Pure-JAX f32 mirror of the PyTorch module, for correctness checking."""
    B, C, W, H = x_nchw.shape
    N = W * H
    xf = x_nchw.reshape(B, C, N)
    q = jnp.einsum("bcn,cd->bdn", xf, p["wq"]) + p["bq"][None, :, None]   # [B, C8, N]
    k = jnp.einsum("bcn,cd->bdn", xf, p["wk"]) + p["bk"][None, :, None]   # [B, C8, N]
    v = jnp.einsum("bcn,cd->bdn", xf, p["wv"]) + p["bv"][None, :, None]   # [B, C, N]
    energy = jnp.einsum("bdn,bdm->bnm", q, k)            # bmm(q^T, k)
    attention = jax.nn.softmax(energy, axis=-1)
    out = jnp.einsum("bcm,bnm->bcn", v, attention)       # bmm(v, attn^T)
    out = out.reshape(B, C, W, H)
    out = p["gamma"][0] * out + x_nchw
    return out, attention


if __name__ == "__main__":
    B, C, W, H = 2, 64, 16, 16           # C//8 = 8, N = 256
    key = jax.random.PRNGKey(0)
    kx, kp = jax.random.split(key)

    x = jax.random.normal(kx, (B, C, W, H), jnp.float32)
    params = init_self_attn_params(kp, C)
    # gamma is zero-initialized in the module (trainable); use a nonzero value
    # here so the residual path is actually exercised by the check.
    params["gamma"] = jnp.array([0.37], jnp.float32)

    out, attn = jax.block_until_ready(self_attn_forward(x, params))
    out_ref, attn_ref = self_attn_reference(x, params)

    assert out.shape == (B, C, W, H), out.shape
    assert attn.shape == (B, W * H, W * H), attn.shape

    # Matmuls intentionally run with bf16 operands (f32 accumulation / f32 softmax),
    # so tolerances vs the pure-f32 reference are loosened (per the perf review).
    attn_err = float(jnp.max(jnp.abs(attn.astype(jnp.float32) - attn_ref)))
    out_err = float(jnp.max(jnp.abs(out - out_ref)))
    assert attn_err < 2e-3, f"attn max abs err {attn_err}"
    assert out_err < 5e-2, f"out max abs err {out_err}"

    print("KERNEL_OK")
</pallas_src>

<mosaic_0001>
module attributes {stable_mosaic.version = 11 : i64} {
  func.func @self_attn_kernel(%arg0: i32, %arg1: i32, %arg2: memref<1x64x256xf32, #tpu.memory_space<vmem>>, %arg3: memref<80x64xbf16, #tpu.memory_space<vmem>>, %arg4: memref<80x1xf32, #tpu.memory_space<vmem>>, %arg5: memref<1xf32, #tpu.memory_space<smem>>, %arg6: memref<1x64x256xf32, #tpu.memory_space<vmem>>, %arg7: memref<1x256x256xf32, #tpu.memory_space<vmem>>, %arg8: memref<256x8xbf16, #tpu.memory_space<vmem>>, %arg9: memref<8x256xbf16, #tpu.memory_space<vmem>>, %arg10: memref<64x256xbf16, #tpu.memory_space<vmem>>) attributes {dimension_semantics = [#tpu.dimension_semantics<parallel>, #tpu.dimension_semantics<arbitrary>], iteration_bounds = array<i64: 2, 1>, scalar_prefetch = 0 : i64, scratch_operands = 3 : i64, tpu.core_type = #tpu.core_type<tc>, window_params = [{transform_indices = @transform_0, window_bounds = array<i64: 1, 64, 256>}, {pipeline_mode = #tpu.pipeline_mode<synchronous>, transform_indices = @transform_1, window_bounds = array<i64: 80, 64>}, {pipeline_mode = #tpu.pipeline_mode<synchronous>, transform_indices = @transform_2, window_bounds = array<i64: 80, 1>}, {transform_indices = @transform_3, window_bounds = array<i64: 1>}, {transform_indices = @transform_4, window_bounds = array<i64: 1, 64, 256>}, {transform_indices = @transform_5, window_bounds = array<i64: 1, 256, 256>}]} {
    %c0_i32 = arith.constant 0 : i32
    %0 = arith.cmpi eq, %arg1, %c0_i32 : i32
    %1 = arith.extui %0 : i1 to i32
    %c0_i32_0 = arith.constant 0 : i32
    %2 = arith.cmpi ne, %1, %c0_i32_0 : i32
    scf.if %2 {
      %c0_17 = arith.constant 0 : index
      %c0_18 = arith.constant 0 : index
      %c0_19 = arith.constant 0 : index
      %35 = vector.load %arg2[%c0_17, %c0_18, %c0_19] : memref<1x64x256xf32, #tpu.memory_space<vmem>>, vector<1x64x256xf32>
      %36 = vector.shape_cast %35 : vector<1x64x256xf32> to vector<64x256xf32>
      %37 = arith.truncf %36 : vector<64x256xf32> to vector<64x256xbf16>
      %c0_20 = arith.constant 0 : index
      %c0_21 = arith.constant 0 : index
      %38 = vector.load %arg3[%c0_20, %c0_21] : memref<80x64xbf16, #tpu.memory_space<vmem>>, vector<80x64xbf16>
      %cst_22 = arith.constant dense<0.000000e+00> : vector<80x256xf32>
      %39 = tpu.matmul %38, %37, %cst_22 {dimension_numbers = #tpu.dot_dimension_numbers<[1], [0], [0], [1], [0, 0, 1, 1], [], []>} : vector<80x64xbf16>, vector<64x256xbf16>, vector<80x256xf32> -> vector<80x256xf32>
      %c0_23 = arith.constant 0 : index
      %c0_24 = arith.constant 0 : index
      %40 = vector.load %arg4[%c0_23, %c0_24] : memref<80x1xf32, #tpu.memory_space<vmem>>, vector<80x1xf32>
      %41 = vector.broadcast %40 : vector<80x1xf32> to vector<80x256xf32>
      %42 = arith.addf %39, %41 : vector<80x256xf32>
      %43 = vector.extract_strided_slice %42 {offsets = [0, 0], sizes = [8, 256], strides = [1, 1]} : vector<80x256xf32> to vector<8x256xf32>
      %44 = tpu.transpose %43, [1, 0] : vector<8x256xf32> -> vector<256x8xf32>
      %45 = arith.truncf %44 : vector<256x8xf32> to vector<256x8xbf16>
      %c0_25 = arith.constant 0 : index
      %c0_26 = arith.constant 0 : index
      %46 = vector.load %arg8[%c0_25, %c0_26] : memref<256x8xbf16, #tpu.memory_space<vmem>>, vector<256x8xbf16>
      tpu.vector_store %arg8[%c0_25, %c0_26], %45 {strides = array<i32>} : memref<256x8xbf16, #tpu.memory_space<vmem>>, vector<256x8xbf16>,
      %47 = vector.extract_strided_slice %42 {offsets = [8, 0], sizes = [8, 256], strides = [1, 1]} : vector<80x256xf32> to vector<8x256xf32>
      %48 = arith.truncf %47 : vector<8x256xf32> to vector<8x256xbf16>
      %c0_27 = arith.constant 0 : index
      %c0_28 = arith.constant 0 : index
      %49 = vector.load %arg9[%c0_27, %c0_28] : memref<8x256xbf16, #tpu.memory_space<vmem>>, vector<8x256xbf16>
      tpu.vector_store %arg9[%c0_27, %c0_28], %48 {strides = array<i32>} : memref<8x256xbf16, #tpu.memory_space<vmem>>, vector<8x256xbf16>,
      %50 = vector.extract_strided_slice %42 {offsets = [16, 0], sizes = [64, 256], strides = [1, 1]} : vector<80x256xf32> to vector<64x256xf32>
      %51 = arith.truncf %50 : vector<64x256xf32> to vector<64x256xbf16>
      %c0_29 = arith.constant 0 : index
      %c0_30 = arith.constant 0 : index
      %52 = vector.load %arg10[%c0_29, %c0_30] : memref<64x256xbf16, #tpu.memory_space<vmem>>, vector<64x256xbf16>
      tpu.vector_store %arg10[%c0_29, %c0_30], %51 {strides = array<i32>} : memref<64x256xbf16, #tpu.memory_space<vmem>>, vector<64x256xbf16>,
    } else {
    }
    %c256_i32 = arith.constant 256 : i32
    %3 = arith.muli %arg1, %c256_i32 : i32
    %4 = tpu.assume_multiple %3, 256 : i32
    %5 = arith.index_cast %4 : i32 to index
    %c0 = arith.constant 0 : index
    %6 = vector.load %arg8[%5, %c0] : memref<256x8xbf16, #tpu.memory_space<vmem>>, vector<256x8xbf16>
    %c0_1 = arith.constant 0 : index
    %c0_2 = arith.constant 0 : index
    %7 = vector.load %arg9[%c0_1, %c0_2] : memref<8x256xbf16, #tpu.memory_space<vmem>>, vector<8x256xbf16>
    %cst = arith.constant dense<0.000000e+00> : vector<256x256xf32>
    %8 = tpu.matmul %6, %7, %cst {dimension_numbers = #tpu.dot_dimension_numbers<[1], [0], [0], [1], [0, 0, 1, 1], [], []>} : vector<256x8xbf16>, vector<8x256xbf16>, vector<256x256xf32> -> vector<256x256xf32>
    %cst_3 = arith.constant dense<0xFF800000> : vector<256xf32>
    %9 = vector.multi_reduction <maximumf>, %8, %cst_3 [1] : vector<256x256xf32> to vector<256xf32>
    %10 = vector.shape_cast %9 : vector<256xf32> to vector<256x1xf32>
    %11 = vector.broadcast %10 : vector<256x1xf32> to vector<256x256xf32>
    %12 = arith.subf %8, %11 : vector<256x256xf32>
    %13 = math.exp %12 : vector<256x256xf32>
    %cst_4 = arith.constant dense<0.000000e+00> : vector<256xf32>
    %14 = vector.multi_reduction <add>, %13, %cst_4 [1] : vector<256x256xf32> to vector<256xf32>
    %15 = vector.shape_cast %14 : vector<256xf32> to vector<256x1xf32>
    %16 = tpu.reciprocal %15 {approx = true} : vector<256x1xf32> -> vector<256x1xf32>
    %17 = vector.broadcast %16 : vector<256x1xf32> to vector<256x256xf32>
    %18 = arith.mulf %13, %17 : vector<256x256xf32>
    %c0_5 = arith.constant 0 : index
    %c0_6 = arith.constant 0 : index
    %19 = vector.load %arg10[%c0_5, %c0_6] : memref<64x256xbf16, #tpu.memory_space<vmem>>, vector<64x256xbf16>
    %20 = arith.truncf %18 : vector<256x256xf32> to vector<256x256xbf16>
    %cst_7 = arith.constant dense<0.000000e+00> : vector<64x256xf32>
    %21 = tpu.matmul %19, %20, %cst_7 {dimension_numbers = #tpu.dot_dimension_numbers<[1], [1], [0], [0], [0, 0, 1, 0], [], []>} : vector<64x256xbf16>, vector<256x256xbf16>, vector<64x256xf32> -> vector<64x256xf32>
    %c0_8 = arith.constant 0 : index
    %c0_9 = arith.constant 0 : index
    %22 = arith.index_cast %4 : i32 to index
    %23 = vector.load %arg2[%c0_8, %c0_9, %22] : memref<1x64x256xf32, #tpu.memory_space<vmem>>, vector<1x64x256xf32>
    %24 = vector.shape_cast %23 : vector<1x64x256xf32> to vector<64x256xf32>
    %c0_10 = arith.constant 0 : index
    %25 = memref.load %arg5[%c0_10] : memref<1xf32, #tpu.memory_space<smem>>
    %26 = vector.broadcast %25 : f32 to vector<64x256xf32>
    %27 = arith.mulf %26, %21 : vector<64x256xf32>
    %28 = arith.addf %27, %24 : vector<64x256xf32>
    %c0_11 = arith.constant 0 : index
    %c0_12 = arith.constant 0 : index
    %c0_13 = arith.constant 0 : index
    %29 = vector.load %arg6[%c0_11, %c0_12, %c0_13] : memref<1x64x256xf32, #tpu.memory_space<vmem>>, vector<1x64x256xf32>
    %30 = vector.shape_cast %29 : vector<1x64x256xf32> to vector<64x256xf32>
    %31 = vector.shape_cast %28 : vector<64x256xf32> to vector<1x64x256xf32>
    tpu.vector_store %arg6[%c0_11, %c0_12, %c0_13], %31 {strides = array<i32>} : memref<1x64x256xf32, #tpu.memory_space<vmem>>, vector<1x64x256xf32>,
    %c0_14 = arith.constant 0 : index
    %c0_15 = arith.constant 0 : index
    %c0_16 = arith.constant 0 : index
    %32 = vector.load %arg7[%c0_14, %c0_15, %c0_16] : memref<1x256x256xf32, #tpu.memory_space<vmem>>, vector<1x256x256xf32>
    %33 = vector.shape_cast %32 : vector<1x256x256xf32> to vector<256x256xf32>
    %34 = vector.shape_cast %18 : vector<256x256xf32> to vector<1x256x256xf32>
    tpu.vector_store %arg7[%c0_14, %c0_15, %c0_16], %34 {strides = array<i32>} : memref<1x256x256xf32, #tpu.memory_space<vmem>>, vector<1x256x256xf32>,
    return
  }
  func.func @transform_0(%arg0: i32, %arg1: i32) -> (i32, i32, i32) {
    %c0_i32 = arith.constant 0 : i32
    %c0_i32_0 = arith.constant 0 : i32
    %c0_i32_1 = arith.constant 0 : i32
    return %arg0, %c0_i32, %c0_i32_0 : i32, i32, i32
  }
  func.func @transform_1(%arg0: i32, %arg1: i32) -> (i32, i32) {
    %c0_i32 = arith.constant 0 : i32
    %c0_i32_0 = arith.constant 0 : i32
    %c0_i32_1 = arith.constant 0 : i32
    return %c0_i32, %c0_i32_0 : i32, i32
  }
  func.func @transform_2(%arg0: i32, %arg1: i32) -> (i32, i32) {
    %c0_i32 = arith.constant 0 : i32
    %c0_i32_0 = arith.constant 0 : i32
    %c0_i32_1 = arith.constant 0 : i32
    return %c0_i32, %c0_i32_0 : i32, i32
  }
  func.func @transform_3(%arg0: i32, %arg1: i32) -> i32 {
    %c0_i32 = arith.constant 0 : i32
    %c0_i32_0 = arith.constant 0 : i32
    return %c0_i32 : i32
  }
  func.func @transform_4(%arg0: i32, %arg1: i32) -> (i32, i32, i32) {
    %c0_i32 = arith.constant 0 : i32
    %c0_i32_0 = arith.constant 0 : i32
    return %arg0, %c0_i32, %arg1 : i32, i32, i32
  }
  func.func @transform_5(%arg0: i32, %arg1: i32) -> (i32, i32, i32) {
    %c0_i32 = arith.constant 0 : i32
    %c0_i32_0 = arith.constant 0 : i32
    return %arg0, %arg1, %c0_i32 : i32, i32, i32
  }
}

</mosaic_0001>

<bundles_post_ra>
// kernel: tpu_custom_call.1
= control target key start
LH: loop header
LB: loop body
LE: loop exit
PB: predicated region body
PF: predicated region fallthrough
CT: control target
= control target key end

     0   :  { %s3369_s0 = inlined_call_operand.hbm [shape: f32[2,64,256], index: 0, kind: input, shape index: {}]   ;;  %s3370_s1 = inlined_call_operand.vmem [shape: bf16[80,64], index: 1, kind: input, shape index: {}]   ;;  %s3371_s2 = inlined_call_operand.vmem [shape: f32[80,1], index: 2, kind: input, shape index: {}]   ;;  %s3372_s3 = inlined_call_operand.<no memory space> [shape: f32[1], index: 3, kind: input, shape index: {}]   ;;  %s3373_s4 = inlined_call_operand.hbm [shape: f32[2,64,256], index: 4, kind: output, shape index: {0}]   ;;  %s3374_s5 = inlined_call_operand.hbm [shape: f32[2,256,256], index: 5, kind: output, shape index: {1}]  }
   0x1   :  { %11 = sst [smem:[#allocation5]] %s3372_s3 }
   0x2   :  { %12 = vsyncpa [#allocation7], 0 }
   0x3   :  { %14 = vsyncpa [#allocation7 + $0x1], 0 }
   0x4   :  { %15 = vsyncpa [#allocation8], 0 }
   0x5   :  { %17 = vsyncpa [#allocation8 + $0x1], 0 }
   0x6   :  { %18 = vsyncpa [#allocation11], 0 }
   0x7   :  { %20 = vsyncpa [#allocation11 + $0x1], 0  ;;  %s2330_s20 = smov 0   ;;  %s2332_s21 = smov 0  }
   0x8   :  { %s2334_s22 = smov 0   ;;  %s2336_s23 = smov 0  }
   0x9   :  { %s2338_s24 = smov 0   ;;  %s2340_s25 = smov 0  }
   0xa LB: > { %s1784_s3 = sadd.s32 4294967295, %s2287_s25   ;;  %s1785_s26 = sadd.s32 4294967294, %s2287_s25   ;;  %s2287_s25 = sphi %s2340_s25, %s26_s25   ;;  %s2283_s24 = sphi %s2338_s24, %s3477_s24   ;;  %s2279_s23 = sphi %s2336_s23, %s3476_s23   ;;  %s2275_s22 = sphi %s2334_s22, %s3475_s22   ;;  %s2271_s21 = sphi %s2332_s21, %s3474_s21   ;;  %s2267_s20 = sphi %s2330_s20, %s3473_s20  }
   0xb   : > { %s38_s27 = sadd.s32 1, %s2283_s24  ;;  %s45_s28 = sadd.s32 1, %s2275_s22 }
   0xc   : > { %p40_p0 = scmp.ge.s32.totalorder %s38_s27, 2  ;;  %p52_p1 = scmp.ne.s32.totalorder %s2275_s22, %s2271_s21 }
   0xd   : > { %p53_p2 = scmp.eq.s32.totalorder %s2287_s25, 0  ;;  %p58_p3 = scmp.ne.s32.totalorder %s2271_s21, %s2267_s20 }
   0xe   : > { %s3479_s27 = smov (%p40_p0, %s38_s27), 0  ;;  %p59_p5 = scmp.eq.s32.totalorder %s1784_s3, 0 }
   0xf   : > { %p2371_p4 = por %p53_p2, %p52_p1  ;;  %s42_s30 = ssub.s32 %s2283_s24, %s3479_s27 }
  0x10   : > { %p147_p6 = scmp.eq.s32.totalorder %s1784_s3, 1  ;;  %p43_p7 = scmp.eq.s32.totalorder %s42_s30, 0 }
  0x11   : > { %p2377_p8 = por %p59_p5, %p58_p3  ;;  %p153_p10 = scmp.eq.s32.totalorder %s1785_s26, 1 }
  0x12   : > { %p2381_p9 = por %p147_p6, %p52_p1  ;;  %p1888_p13 = scmp.lt.s32.totalorder %s2287_s25, 2 }
  0x13   : > { %s2386_s8 = scalar_select %p43_p7, %s2275_s22, %s45_s28  }
  0x14   : > { %s3405_s7 = scalar_select %p2381_p9, 1, 0 }
  0x15   : > { %p2388_p11 = por %p153_p10, %p58_p3  ;;  %s210_s10 = sand.u32 1, %s2275_s22  }
  0x16   : > { %s1788_s11 = sshll.u32 %s210_s10, 7  ;;  %s1833_s12 = sshll.u32 %s2283_s24, 11 }
  0x17   : > { %s3406_s9 = scalar_select %p2388_p11, 1, 0 }
  0x18   : > { %s2399_s15 = scalar_lea.hbm %s3369_s0, %s1833_s12  ;;  %s214_s16 = scalar_lea.vmem [#allocation6], %s1788_s11 }
  0x19   : > { %s221_s17 = sshll.u32 %s214_s16, 4  ;;  %p2405_p0 = pnand %p1888_p13, %p2371_p4  ;;  %s2401_s17 = int_to_ptr.vmem [resolvable:$true] %s221_s17 }
  0x1a   : > { %s2410_s19 = scalar_lea.sflag [#allocation7], %s210_s10  ;;  %s2143_s3 = scalar_lea.hbm %s2399_s15, 2048 }
  0x1b   : > { %p2144_p2 = scmp.ne.s32.totalorder %s2399_s15, %s2143_s3  ;;  %p2145_p3 = pneg %p2405_p0 }
  0x1c   : > { %s2148_s29 = scalar_lea.hbm %s3369_s0, 4096  ;;  %p2149_p4 = scmp.lt.u32.totalorder %s2399_s15, %s3369_s0 }
  0x1d   : > { %p2146_p5 = pnand %p2145_p3, %p2144_p2  ;;  %p2150_p7 = scmp.lt.u32.totalorder %s2148_s29, %s2143_s3 }
  0x1e   : > { %p2152_p13 = scmp.lt.u32.totalorder %s2143_s3, %s2399_s15 }
  0x1f   : > { %p2147_p6 = pneg %p2146_p5  ;;  %p2151_p10 = por %p2150_p7, %p2149_p4 }
  0x21   : > { %p2153_p12 = por %p2152_p13, %p2151_p10 }
  0x23   : > { %p2154_p1 = pnand %p2153_p12, %p2147_p6 }
  0x25   : > { %2157 = shalt.err (!%p2154_p1)
}
  0x26   : > { %s2158_s10 = scalar_lea.vmem %s2401_s17, 2048  ;;  %s2289_s12 = smov [#allocation6]  }
  0x27   : > { %p2159_p2 = scmp.ne.s32.totalorder %s2401_s17, %s2158_s10  ;;  %s2163_s13 = sshll.u32 %s2289_s12, 4  ;;  %s2164_s13 = int_to_ptr.vmem [resolvable:$false] %s2163_s13 }
  0x28   : > { %s2165_s14 = scalar_lea.vmem %s2164_s13, 4096  ;;  %p2166_p9 = scmp.lt.s32.totalorder %s2401_s17, %s2164_s13 }
  0x29   : > { %p2161_p5 = pnand %p2159_p2, %p2145_p3  ;;  %p2167_p4 = scmp.lt.s32.totalorder %s2165_s14, %s2158_s10 }
  0x2b   : > { %p2162_p11 = pneg %p2161_p5  ;;  %p2168_p7 = por %p2167_p4, %p2166_p9 }
  0x2d   : > { %p2169_p10 = pnand %p2168_p7, %p2162_p11 }
  0x2f   : > { %2172 = shalt.err (!%p2169_p10)
}
  0x30   : > { %s2290_s16 = smov 256   ;;  %s2291_s3 = smov 16  }
  0x31   : > { %1880 = dma.hbm_to_vmem [thread:$0]  (!%p2405_p0), %s2399_s15, 2048, %s2401_s17, %s2410_s19, %s2290_s16, %s2290_s16, %s2291_s3  }
  0x32   : > { %p229_p12 = scmp.lt.s32.totalorder %s2287_s25, 3  ;;  %p3408_p1 = scmp.ge.s32.totalorder %s2287_s25, 1 }
  0x34   : > { %p230_p3 = pnand %p3408_p1, %p229_p12 }
  0x36   : > { %233 = sbr.rel (%p230_p3) target bundleno = 1422 (0x58e), region = 36 }
  0x3d   : > { %s2442_s26 = sand.u32 1, %s2271_s21  }
  0x3e   : > { %s1792_s28 = sshll.u32 %s2442_s26, 7  ;;  %s236_s29 = scalar_lea.sflag [#allocation7], %s2442_s26 }
  0x3f   : > { %s2448_s30 = scalar_lea.vmem [#allocation6], %s1792_s28 }
  0x40   : > { %2254 = dma.done.wait (%p2377_p8), %s236_s29, 2048  }
  0x41   : > { %2256 = vsyncadd (%p2377_p8), %s236_s29, 4294965248  ;;  %v3376_v0 = vmov 0   ;;  %v279_v1 = vld [vmem:[%s2448_s30 + $0x8] sm:$0xff]  ;;  %v281_v2 = vld [vmem:[%s2448_s30 + $0x18] sm:$0xff]  ;;  %vm397_vm0 = vcmask 523264   ;;  %vm694_vm1 = vcmask 1043456  }
  0x42   : > { %445 = vmatprep.mubr.bf16.mxu0 %v3376_v0  ;;  %1944 = vset.pattern.permute.xlu0 %v3376_v0  ;;  %v278_v3 = vld [vmem:[%s2448_s30] sm:$0xff]  ;;  %v295_v4 = vpack.c.bf16 %v281_v2, %v279_v1  ;;  %v280_v5 = vld [vmem:[%s2448_s30 + $0x10] sm:$0xff]  ;;  %v283_v6 = vld [vmem:[%s2448_s30 + $0x28] sm:$0xff]  ;;  %vm576_vm2 = vcmask 64512   ;;  %s1794_s18 = sshll.u32 %s2442_s26, 9  ;;  %s1836_s12 = sshll.u32 %s2279_s23, 13 }
  0x43   : > { %733 = vmatprep.mubr.bf16.mxu1 %v3376_v0  ;;  %v285_v7 = vld [vmem:[%s2448_s30 + $0x38] sm:$0xff]  ;;  %v294_v8 = vpack.c.bf16 %v280_v5, %v278_v3  ;;  %v282_v10 = vld [vmem:[%s2448_s30 + $0x20] sm:$0xff]  ;;  %v284_v11 = vld [vmem:[%s2448_s30 + $0x30] sm:$0xff]  ;;  %s3003_s19 = scalar_lea.vmem [#allocation10], %s1794_s18  ;;  %s3225_s3 = scalar_lea.hbm %s3374_s5, %s1836_s12 }
  0x44   : > { %v297_v9 = vpack.c.bf16 %v285_v7, %v283_v6  ;;  %v287_v12 = vld [vmem:[%s2448_s30 + $0x48] sm:$0xff]  ;;  %413 = vmatprep.subr.bf16.mxu0 %v295_v4  ;;  %v289_v13 = vld [vmem:[%s2448_s30 + $0x58] sm:$0xff]  ;;  %v296_v14 = vpack.c.bf16 %v284_v11, %v282_v10  ;;  %v286_v15 = vld [vmem:[%s2448_s30 + $0x40] sm:$0xff]  ;;  %s1661_s13 = sshll.u32 %s3003_s19, 4  ;;  %s1627_s29 = scalar_lea.sflag [#allocation11], %s2442_s26  ;;  %s3227_s13 = int_to_ptr.vmem [resolvable:$true] %s1661_s13 }
  0x45   : > { %414 = vmatpush1.bf16.msra.mxu0 %v294_v8  ;;  %v288_v16 = vld [vmem:[%s2448_s30 + $0x50] sm:$0xff]  ;;  %v299_v17 = vpack.c.bf16 %v289_v13, %v287_v12  ;;  %v291_v18 = vld [vmem:[%s2448_s30 + $0x68] sm:$0xff]  ;;  %v293_v19 = vld [vmem:[%s2448_s30 + $0x78] sm:$0xff]  ;;  %s2173_s6 = scalar_lea.vmem %s3227_s13, 8192  ;;  %p3470_p9 = scmp.ne.s32.totalorder %s3405_s7, 0 }
  0x46   : > { %415 = vmatprep.subr.bf16.mxu0 %v297_v9  ;;  %v312_v20 = vld [vmem:[%s3371_s2] sm:$0xff]  ;;  %v313_v21 = vld [vmem:[%s3371_s2 + $0x8] sm:$0xff]  ;;  %v298_v23 = vpack.c.bf16 %v288_v16, %v286_v15  ;;  %v301_v24 = vpack.c.bf16 %v293_v19, %v291_v18  ;;  %v292_v25 = vld [vmem:[%s2448_s30 + $0x70] sm:$0xff]  ;;  %p2174_p8 = scmp.ne.s32.totalorder %s3227_s13, %s2173_s6  ;;  %s2293_s15 = smov [#allocation10]  }
  0x47   : > { %v290_v22 = vld [vmem:[%s2448_s30 + $0x60] sm:$0xff]  ;;  %324 = vperm.xlu0 %1944, %v312_v20   ;;  %s2177_s17 = sshll.u32 %s2293_s15, 4  ;;  %s2178_s17 = int_to_ptr.vmem [resolvable:$false] %s2177_s17 }
  0x48   : > { %v300_v26 = vpack.c.bf16 %v292_v25, %v290_v22  ;;  %v1946_v27 = vld [vmem:[%s3370_s1] sm:$0xff]   ;;  %p2175_p11 = pnand %p2174_p8, %p3470_p9  ;;  %p2180_p6 = scmp.lt.s32.totalorder %s3227_s13, %s2178_s17 }
  0x49   : > { %416 = vmatpush1.bf16.msra.mxu0 %v296_v14 }
  0x4a   : > { %417 = vmatprep.subr.bf16.mxu0 %v299_v17  ;;  %p2176_p0 = pneg %p2175_p11 }
  0x4b   : > { %329 = vperm.xlu0 %1944, %v313_v21  }
  0x4d   : > { %418 = vmatpush1.bf16.msra.mxu0 %v298_v23 }
  0x4e   : > { %419 = vmatprep.subr.bf16.mxu0 %v301_v24 }
  0x51   : > { %420 = vmatpush1.bf16.msra.mxu0 %v300_v26 }
  0x54   : > { %1800 = vmatmul.mubr.msk.bf16.vlgmr.msra.gmra.mrb[0].mxu0 %vm397_vm0, %v1946_v27 }
  0x55   : > { %455 = vmatprep.mubr.bf16.mxu0 %v3376_v0 }
  0xc6   : > { %v325_v28 = vpop.permute.xlu0 %324 }
  0xca   : > { %v330_v32 = vpop.permute.xlu0 %329 }
 0x127   : > { %v447_v29 = vpop.f32.mrb[0].mxu0 }
 0x128   : > { %v449_v30 = vpop.f32.mrb[1].mxu0  ;;  %v448_v31 = vadd.f32 %v447_v29, %v325_v28 }
 0x129   : > { %v451_v33 = vpop.f32.mrb[2].mxu0  ;;  %v450_v40 = vadd.f32 %v449_v30, %v325_v28 }
 0x12a   : > { %v452_v34 = vadd.f32 %v451_v33, %v330_v32  ;;  %v453_v35 = vpop.f32.mrb[3].mxu0  ;;  %496 = vxpose.xlu1.b32.start.end [1/1] (short) %v448_v31, 128 }
 0x12b   : > { %v454_v36 = vadd.f32 %v453_v35, %v330_v32 }
 0x12c   : > { %v1837_v37 = vpack.c.bf16 %v452_v34, %v452_v34 }
 0x12d   : > { %v1838_v38 = vpack.c.bf16 %v454_v36, %v454_v36 }
 0x12e   : > { %v696_v39 = vsel %vm694_vm1, %v1837_v37, 0 }
 0x12f   : > { %1808 = vmatprep.subr.msk.bf16.mxu1 %vm694_vm1, %v1838_v38 }
 0x130   : > { %702 = vmatpush1.bf16.msra.mxu1 %v696_v39 }
 0x167   : > { %528 = vxpose.xlu1.b32.start.end [1/1] (short) %v450_v40, 128 }
 0x185   : > { %1945 = vset.pattern.permute.xlu1 %v3376_v0 }
 0x1aa   : > { %v512_v41 = vpop.trf.xlu1 }
 0x1ae   : > { %v513_v42 = vpop.trf.xlu1 }
 0x1af   : > { %v560_v43 = vpack.c.bf16 %v513_v42, %v512_v41 }
 0x1b1   : > { %577 = vst.msk [vmem:[#allocation2] sm:$0xff] %vm576_vm2, %v560_v43 }
 0x1b2   : > { %v514_v44 = vpop.trf.xlu1 }
 0x1b6   : > { %v515_v45 = vpop.trf.xlu1 }
 0x1b7   : > { %v561_v46 = vpack.c.bf16 %v515_v45, %v514_v44 }
 0x1b8   : > { %v623_v47 = vld [vmem:[#allocation2] sm:$0xff] }
 0x1b9   : > { %578 = vst.msk [vmem:[#allocation2 + $0x8] sm:$0xff] %vm576_vm2, %v561_v46  ;;  %1809 = vmatmul.mubr.msk.bf16.vlgmr.msra.gmra.mrb[0].mxu1 %vm576_vm2, %v623_v47 }
 0x1ba   : > { %v516_v48 = vpop.trf.xlu1  ;;  %743 = vmatprep.mubr.bf16.mxu1 %v3376_v0 }
 0x1be   : > { %v517_v49 = vpop.trf.xlu1 }
 0x1bf   : > { %v562_v50 = vpack.c.bf16 %v517_v49, %v516_v48 }
 0x1c0   : > { %v624_v51 = vld [vmem:[#allocation2 + $0x8] sm:$0xff] }
 0x1c1   : > { %579 = vst.msk [vmem:[#allocation2 + $0x10] sm:$0xff] %vm576_vm2, %v562_v50  ;;  %1810 = vmatmul.mubr.msk.bf16.gmra.mrb[4].mxu1 %vm576_vm2, %v624_v51 }
 0x1c2   : > { %v518_v52 = vpop.trf.xlu1  ;;  %753 = vmatprep.mubr.bf16.mxu1 %v3376_v0 }
 0x1c6   : > { %v519_v53 = vpop.trf.xlu1 }
 0x1c7   : > { %v563_v54 = vpack.c.bf16 %v519_v53, %v518_v52 }
 0x1c8   : > { %v625_v55 = vld [vmem:[#allocation2 + $0x10] sm:$0xff] }
 0x1c9   : > { %580 = vst.msk [vmem:[#allocation2 + $0x18] sm:$0xff] %vm576_vm2, %v563_v54  ;;  %1811 = vmatmul.mubr.msk.bf16.gmra.mrb[8].mxu1 %vm576_vm2, %v625_v55 }
 0x1ca   : > { %v520_v56 = vpop.trf.xlu1  ;;  %763 = vmatprep.mubr.bf16.mxu1 %v3376_v0 }
 0x1ce   : > { %v521_v57 = vpop.trf.xlu1 }
 0x1cf   : > { %v564_v58 = vpack.c.bf16 %v521_v57, %v520_v56 }
 0x1d0   : > { %v626_v59 = vld [vmem:[#allocation2 + $0x18] sm:$0xff] }
 0x1d1   : > { %581 = vst.msk [vmem:[#allocation2 + $0x20] sm:$0xff] %vm576_vm2, %v564_v58  ;;  %1812 = vmatmul.mubr.msk.bf16.gmra.mrb[12].mxu1 %vm576_vm2, %v626_v59 }
 0x1d2   : > { %v522_v60 = vpop.trf.xlu1  ;;  %773 = vmatprep.mubr.bf16.mxu1 %v3376_v0 }
 0x1d6   : > { %v523_v61 = vpop.trf.xlu1 }
 0x1d7   : > { %v565_v62 = vpack.c.bf16 %v523_v61, %v522_v60 }
 0x1d8   : > { %v627_v63 = vld [vmem:[#allocation2 + $0x20] sm:$0xff] }
 0x1d9   : > { %582 = vst.msk [vmem:[#allocation2 + $0x28] sm:$0xff] %vm576_vm2, %v565_v62  ;;  %1813 = vmatmul.mubr.msk.bf16.gmra.mrb[16].mxu1 %vm576_vm2, %v627_v63 }
 0x1da   : > { %v524_v1 = vpop.trf.xlu1  ;;  %783 = vmatprep.mubr.bf16.mxu1 %v3376_v0 }
 0x1de   : > { %v525_v2 = vpop.trf.xlu1 }
 0x1df   : > { %v566_v3 = vpack.c.bf16 %v525_v2, %v524_v1 }
 0x1e0   : > { %v628_v4 = vld [vmem:[#allocation2 + $0x28] sm:$0xff] }
 0x1e1   : > { %583 = vst.msk [vmem:[#allocation2 + $0x30] sm:$0xff] %vm576_vm2, %v566_v3  ;;  %1814 = vmatmul.mubr.msk.bf16.gmra.mrb[20].mxu1 %vm576_vm2, %v628_v4 }
 0x1e2   : > { %v526_v5 = vpop.trf.xlu1  ;;  %793 = vmatprep.mubr.bf16.mxu1 %v3376_v0 }
 0x1e6   : > { %v527_v6 = vpop.trf.xlu1 }
 0x1e7   : > { %v567_v7 = vpack.c.bf16 %v527_v6, %v526_v5 }
 0x1e8   : > { %v629_v8 = vld [vmem:[#allocation2 + $0x30] sm:$0xff] }
 0x1e9   : > { %584 = vst.msk [vmem:[#allocation2 + $0x38] sm:$0xff] %vm576_vm2, %v567_v7  ;;  %1815 = vmatmul.mubr.msk.bf16.gmra.mrb[24].mxu1 %vm576_vm2, %v629_v8 }
 0x1ea   : > { %v544_v9 = vpop.trf.xlu1  ;;  %803 = vmatprep.mubr.bf16.mxu1 %v3376_v0 }
 0x1ee   : > { %v545_v10 = vpop.trf.xlu1 }
 0x1ef   : > { %v568_v11 = vpack.c.bf16 %v545_v10, %v544_v9 }
 0x1f0   : > { %v630_v12 = vld [vmem:[#allocation2 + $0x38] sm:$0xff] }
 0x1f1   : > { %585 = vst.msk [vmem:[#allocation2 + $0x40] sm:$0xff] %vm576_vm2, %v568_v11  ;;  %1816 = vmatmul.mubr.msk.bf16.gmra.mrb[28].mxu1 %vm576_vm2, %v630_v12 }
 0x1f2   : > { %v546_v13 = vpop.trf.xlu1  ;;  %813 = vmatprep.mubr.bf16.mxu1 %v3376_v0 }
 0x1f6   : > { %v547_v14 = vpop.trf.xlu1 }
 0x1f7   : > { %v569_v15 = vpack.c.bf16 %v547_v14, %v546_v13 }
 0x1f8   : > { %v631_v16 = vld [vmem:[#allocation2 + $0x40] sm:$0xff] }
 0x1f9   : > { %586 = vst.msk [vmem:[#allocation2 + $0x48] sm:$0xff] %vm576_vm2, %v569_v15  ;;  %1817 = vmatmul.mubr.msk.bf16.gmra.mrb[32].mxu1 %vm576_vm2, %v631_v16 }
 0x1fa   : > { %v548_v17 = vpop.trf.xlu1  ;;  %823 = vmatprep.mubr.bf16.mxu1 %v3376_v0 }
 0x1fe   : > { %v549_v18 = vpop.trf.xlu1 }
 0x1ff   : > { %v570_v19 = vpack.c.bf16 %v549_v18, %v548_v17 }
 0x200   : > { %v632_v20 = vld [vmem:[#allocation2 + $0x48] sm:$0xff] }
 0x201   : > { %587 = vst.msk [vmem:[#allocation2 + $0x50] sm:$0xff] %vm576_vm2, %v570_v19  ;;  %1818 = vmatmul.mubr.msk.bf16.gmra.mrb[36].mxu1 %vm576_vm2, %v632_v20 }
 0x202   : > { %v550_v21 = vpop.trf.xlu1  ;;  %833 = vmatprep.mubr.bf16.mxu1 %v3376_v0 }
 0x206   : > { %v551_v22 = vpop.trf.xlu1 }
 0x207   : > { %v571_v23 = vpack.c.bf16 %v551_v22, %v550_v21 }
 0x208   : > { %v633_v24 = vld [vmem:[#allocation2 + $0x50] sm:$0xff] }
 0x209   : > { %588 = vst.msk [vmem:[#allocation2 + $0x58] sm:$0xff] %vm576_vm2, %v571_v23  ;;  %1819 = vmatmul.mubr.msk.bf16.gmra.mrb[40].mxu1 %vm576_vm2, %v633_v24 }
 0x20a   : > { %v552_v25 = vpop.trf.xlu1  ;;  %843 = vmatprep.mubr.bf16.mxu1 %v3376_v0 }
 0x20e   : > { %v553_v26 = vpop.trf.xlu1 }
 0x20f   : > { %v572_v27 = vpack.c.bf16 %v553_v26, %v552_v25 }
 0x210   : > { %v634_v28 = vld [vmem:[#allocation2 + $0x58] sm:$0xff] }
 0x211   : > { %589 = vst.msk [vmem:[#allocation2 + $0x60] sm:$0xff] %vm576_vm2, %v572_v27  ;;  %1820 = vmatmul.mubr.msk.bf16.gmra.mrb[44].mxu1 %vm576_vm2, %v634_v28 }
 0x212   : > { %v554_v29 = vpop.trf.xlu1  ;;  %853 = vmatprep.mubr.bf16.mxu1 %v3376_v0 }
 0x216   : > { %v555_v30 = vpop.trf.xlu1 }
 0x217   : > { %v573_v31 = vpack.c.bf16 %v555_v30, %v554_v29 }
 0x218   : > { %v635_v32 = vld [vmem:[#allocation2 + $0x60] sm:$0xff] }
 0x219   : > { %590 = vst.msk [vmem:[#allocation2 + $0x68] sm:$0xff] %vm576_vm2, %v573_v31  ;;  %1821 = vmatmul.mubr.msk.bf16.gmra.mrb[48].mxu1 %vm576_vm2, %v635_v32 }
 0x21a   : > { %v556_v33 = vpop.trf.xlu1  ;;  %863 = vmatprep.mubr.bf16.mxu1 %v3376_v0 }
 0x21e   : > { %v557_v34 = vpop.trf.xlu1 }
 0x21f   : > { %v574_v35 = vpack.c.bf16 %v557_v34, %v556_v33 }
 0x220   : > { %v636_v36 = vld [vmem:[#allocation2 + $0x68] sm:$0xff] }
 0x221   : > { %591 = vst.msk [vmem:[#allocation2 + $0x70] sm:$0xff] %vm576_vm2, %v574_v35  ;;  %1822 = vmatmul.mubr.msk.bf16.gmra.mrb[52].mxu1 %vm576_vm2, %v636_v36 }
 0x222   : > { %v558_v37 = vpop.trf.xlu1  ;;  %873 = vmatprep.mubr.bf16.mxu1 %v3376_v0 }
 0x226   : > { %v559_v38 = vpop.trf.xlu1 }
 0x227   : > { %v575_v39 = vpack.c.bf16 %v559_v38, %v558_v37 }
 0x228   : > { %v637_v40 = vld [vmem:[#allocation2 + $0x70] sm:$0xff] }
 0x229   : > { %592 = vst.msk [vmem:[#allocation2 + $0x78] sm:$0xff] %vm576_vm2, %v575_v39  ;;  %1823 = vmatmul.mubr.msk.bf16.gmra.mrb[56].mxu1 %vm576_vm2, %v637_v40 }
 0x22a   : > { %883 = vmatprep.mubr.bf16.mxu1 %v3376_v0 }
 0x230   : > { %v638_v41 = vld [vmem:[#allocation2 + $0x78] sm:$0xff] }
 0x231   : > { %1824 = vmatmul.mubr.msk.bf16.gmra.mrb[60].mxu1 %vm576_vm2, %v638_v41 }
 0x28c   : > { %v2532_v42 = vpop.f32.mrb[0].mxu1 }
 0x28d   : > { %v2534_v43 = vpop.f32.mrb[1].mxu1 }
 0x28e   : > { %v2536_v44 = vpop.f32.mrb[2].mxu1  ;;  %v894_v45 = vmax.f32 %v2532_v42, %v2534_v43 }
 0x28f   : > { %v2540_v46 = vpop.f32.mrb[3].mxu1 }
 0x290   : > { %895 = vmax.xlane.f32.xlu0 %v894_v45  ;;  %v897_v47 = vmax.f32 %v2536_v44, %v2540_v46 }
 0x294   : > { %898 = vmax.xlane.f32.xlu0 %v897_v47  ;;  %v2544_v48 = vpop.f32.mrb[4].mxu1 }
 0x295   : > { %v2546_v49 = vpop.f32.mrb[5].mxu1 }
 0x296   : > { %v2548_v50 = vpop.f32.mrb[6].mxu1  ;;  %v900_v51 = vmax.f32 %v2544_v48, %v2546_v49 }
 0x297   : > { %v2552_v52 = vpop.f32.mrb[7].mxu1 }
 0x298   : > { %901 = vmax.xlane.f32.xlu0 %v900_v51  ;;  %v903_v53 = vmax.f32 %v2548_v50, %v2552_v52 }
 0x29c   : > { %904 = vmax.xlane.f32.xlu0 %v903_v53  ;;  %v2556_v54 = vpop.f32.mrb[8].mxu1 }
 0x29d   : > { %v2558_v55 = vpop.f32.mrb[9].mxu1 }
 0x29e   : > { %v2560_v56 = vpop.f32.mrb[10].mxu1  ;;  %v906_v57 = vmax.f32 %v2556_v54, %v2558_v55 }
 0x29f   : > { %v2564_v58 = vpop.f32.mrb[11].mxu1 }
 0x2a0   : > { %907 = vmax.xlane.f32.xlu0 %v906_v57  ;;  %v909_v59 = vmax.f32 %v2560_v56, %v2564_v58  ;;  %v1947_v57 = vld [vmem:[%s3370_s1 + $0x8] sm:$0xff]  }
 0x2a1   : > { %1801 = vmatmul.mubr.msk.bf16.gmra.mrb[4].mxu0 %vm397_vm0, %v1947_v57 }
 0x2a2   : > { %465 = vmatprep.mubr.bf16.mxu0 %v3376_v0 }
 0x2a4   : > { %910 = vmax.xlane.f32.xlu0 %v909_v59  ;;  %v2568_v60 = vpop.f32.mrb[12].mxu1 }
 0x2a5   : > { %v2570_v61 = vpop.f32.mrb[13].mxu1 }
 0x2a6   : > { %v2572_v62 = vpop.f32.mrb[14].mxu1  ;;  %v912_v63 = vmax.f32 %v2568_v60, %v2570_v61 }
 0x2a7   : > { %v2576_v1 = vpop.f32.mrb[15].mxu1 }
 0x2a8   : > { %913 = vmax.xlane.f32.xlu0 %v912_v63  ;;  %v915_v2 = vmax.f32 %v2572_v62, %v2576_v1 }
 0x2ac   : > { %916 = vmax.xlane.f32.xlu0 %v915_v2  ;;  %v2580_v3 = vpop.f32.mrb[16].mxu1 }
 0x2ad   : > { %v2582_v4 = vpop.f32.mrb[17].mxu1 }
 0x2ae   : > { %v2584_v5 = vpop.f32.mrb[18].mxu1  ;;  %v918_v6 = vmax.f32 %v2580_v3, %v2582_v4 }
 0x2af   : > { %v2588_v7 = vpop.f32.mrb[19].mxu1 }
 0x2b0   : > { %919 = vmax.xlane.f32.xlu1 %v918_v6  ;;  %v921_v8 = vmax.f32 %v2584_v5, %v2588_v7 }
 0x2b2   : > { %922 = vmax.xlane.f32.xlu0 %v921_v8 }
 0x2b4   : > { %v2592_v9 = vpop.f32.mrb[20].mxu1 }
 0x2b5   : > { %v2594_v10 = vpop.f32.mrb[21].mxu1 }
 0x2b6   : > { %v924_v11 = vmax.f32 %v2592_v9, %v2594_v10  ;;  %v2598_v12 = vpop.f32.mrb[22].mxu1 }
 0x2b7   : > { %v2600_v13 = vpop.f32.mrb[23].mxu1 }
 0x2b8   : > { %925 = vmax.xlane.f32.xlu0 %v924_v11  ;;  %v927_v14 = vmax.f32 %v2598_v12, %v2600_v13 }
 0x2bc   : > { %928 = vmax.xlane.f32.xlu0 %v927_v14  ;;  %v2604_v15 = vpop.f32.mrb[24].mxu1  ;;  %v1948_v14 = vld [vmem:[%s3370_s1 + $0x10] sm:$0xff]  }
 0x2bd   : > { %v2606_v16 = vpop.f32.mrb[25].mxu1  ;;  %1802 = vmatmul.mubr.msk.bf16.gmra.mrb[8].mxu0 %vm397_vm0, %v1948_v14 }
 0x2be   : > { %v930_v17 = vmax.f32 %v2604_v15, %v2606_v16  ;;  %v2610_v18 = vpop.f32.mrb[26].mxu1  ;;  %475 = vmatprep.mubr.bf16.mxu0 %v3376_v0  ;;  %v3422_v0 = vmov 0  }
 0x2bf   : > { %v2612_v19 = vpop.f32.mrb[27].mxu1 }
 0x2c0   : > { %931 = vmax.xlane.f32.xlu0 %v930_v17  ;;  %v933_v20 = vmax.f32 %v2610_v18, %v2612_v19 }
 0x2c4   : > { %934 = vmax.xlane.f32.xlu0 %v933_v20  ;;  %v2616_v21 = vpop.f32.mrb[28].mxu1 }
 0x2c5   : > { %v2618_v22 = vpop.f32.mrb[29].mxu1 }
 0x2c6   : > { %v936_v23 = vmax.f32 %v2616_v21, %v2618_v22  ;;  %v2622_v24 = vpop.f32.mrb[30].mxu1 }
 0x2c7   : > { %v2624_v25 = vpop.f32.mrb[31].mxu1 }
 0x2c8   : > { %937 = vmax.xlane.f32.xlu0 %v936_v23  ;;  %v939_v26 = vmax.f32 %v2622_v24, %v2624_v25 }
 0x2cc   : > { %940 = vmax.xlane.f32.xlu0 %v939_v26  ;;  %v2628_v27 = vpop.f32.mrb[32].mxu1 }
 0x2cd   : > { %v2630_v28 = vpop.f32.mrb[33].mxu1 }
 0x2ce   : > { %v942_v29 = vmax.f32 %v2628_v27, %v2630_v28  ;;  %v2634_v30 = vpop.f32.mrb[34].mxu1 }
 0x2cf   : > { %v2636_v31 = vpop.f32.mrb[35].mxu1 }
 0x2d0   : > { %943 = vmax.xlane.f32.xlu0 %v942_v29  ;;  %v945_v32 = vmax.f32 %v2634_v30, %v2636_v31 }
 0x2d4   : > { %946 = vmax.xlane.f32.xlu0 %v945_v32  ;;  %v2640_v33 = vpop.f32.mrb[36].mxu1 }
 0x2d5   : > { %v2642_v34 = vpop.f32.mrb[37].mxu1 }
 0x2d6   : > { %v948_v35 = vmax.f32 %v2640_v33, %v2642_v34  ;;  %v2646_v36 = vpop.f32.mrb[38].mxu1 }
 0x2d7   : > { %v2648_v37 = vpop.f32.mrb[39].mxu1 }
 0x2d8   : > { %949 = vmax.xlane.f32.xlu0 %v948_v35  ;;  %v951_v38 = vmax.f32 %v2646_v36, %v2648_v37 }
 0x2dc   : > { %952 = vmax.xlane.f32.xlu0 %v951_v38  ;;  %v2652_v39 = vpop.f32.mrb[40].mxu1 }
 0x2dd   : > { %v2654_v40 = vpop.f32.mrb[41].mxu1 }
 0x2de   : > { %v954_v41 = vmax.f32 %v2652_v39, %v2654_v40  ;;  %v2658_v45 = vpop.f32.mrb[42].mxu1 }
 0x2df   : > { %v2660_v47 = vpop.f32.mrb[43].mxu1 }
 0x2e0   : > { %955 = vmax.xlane.f32.xlu0 %v954_v41  ;;  %v957_v51 = vmax.f32 %v2658_v45, %v2660_v47 }
 0x2e4   : > { %958 = vmax.xlane.f32.xlu0 %v957_v51  ;;  %v2664_v53 = vpop.f32.mrb[44].mxu1 }
 0x2e5   : > { %v2669_v59 = vpop.f32.mrb[45].mxu1 }
 0x2e6   : > { %v960_v63 = vmax.f32 %v2664_v53, %v2669_v59  ;;  %v2673_v2 = vpop.f32.mrb[46].mxu1 }
 0x2e7   : > { %v2676_v6 = vpop.f32.mrb[47].mxu1 }
 0x2e8   : > { %3409 = vst [vmem:[#allocation15_spill] sm:$0xff] %v2676_v6  ;;  %961 = vmax.xlane.f32.xlu0 %v960_v63  ;;  %v963_v8 = vmax.f32 %v2673_v2, %v2676_v6 }
 0x2ec   : > { %964 = vmax.xlane.f32.xlu0 %v963_v8  ;;  %v2681_v11 = vpop.f32.mrb[48].mxu1 }
 0x2ed   : > { %3410 = vst [vmem:[#allocation16_spill] sm:$0xff] %v2681_v11  ;;  %v2686_v17 = vpop.f32.mrb[49].mxu1 }
 0x2ee   : > { %3411 = vst [vmem:[#allocation17_spill] sm:$0xff] %v2686_v17  ;;  %v966_v20 = vmax.f32 %v2681_v11, %v2686_v17  ;;  %v2690_v23 = vpop.f32.mrb[50].mxu1 }
 0x2ef   : > { %3412 = vst [vmem:[#allocation18_spill] sm:$0xff] %v2690_v23  ;;  %v2693_v26 = vpop.f32.mrb[51].mxu1 }
 0x2f0   : > { %3413 = vst [vmem:[#allocation19_spill] sm:$0xff] %v2693_v26  ;;  %967 = vmax.xlane.f32.xlu0 %v966_v20  ;;  %v969_v29 = vmax.f32 %v2690_v23, %v2693_v26 }
 0x2f4   : > { %970 = vmax.xlane.f32.xlu0 %v969_v29  ;;  %v2698_v32 = vpop.f32.mrb[52].mxu1 }
 0x2f5   : > { %3414 = vst [vmem:[#allocation20_spill] sm:$0xff] %v2698_v32  ;;  %v2700_v35 = vpop.f32.mrb[53].mxu1 }
 0x2f6   : > { %3415 = vst [vmem:[#allocation21_spill] sm:$0xff] %v2700_v35  ;;  %v972_v38 = vmax.f32 %v2698_v32, %v2700_v35  ;;  %v2704_v41 = vpop.f32.mrb[54].mxu1 }
 0x2f7   : > { %3416 = vst [vmem:[#allocation22_spill] sm:$0xff] %v2704_v41  ;;  %v2706_v51 = vpop.f32.mrb[55].mxu1 }
 0x2f8   : > { %3417 = vst [vmem:[#allocation23_spill] sm:$0xff] %v2706_v51  ;;  %973 = vmax.xlane.f32.xlu0 %v972_v38  ;;  %v975_v57 = vmax.f32 %v2704_v41, %v2706_v51 }
 0x2fc   : > { %976 = vmax.xlane.f32.xlu0 %v975_v57  ;;  %v2710_v63 = vpop.f32.mrb[56].mxu1 }
 0x2fd   : > { %3418 = vst [vmem:[#allocation24_spill] sm:$0xff] %v2710_v63  ;;  %v2712_v8 = vpop.f32.mrb[57].mxu1 }
 0x2fe   : > { %3419 = vst [vmem:[#allocation25_spill] sm:$0xff] %v2712_v8  ;;  %v978_v14 = vmax.f32 %v2710_v63, %v2712_v8  ;;  %v2716_v20 = vpop.f32.mrb[58].mxu1 }
 0x2ff   : > { %v2718_v29 = vpop.f32.mrb[59].mxu1 }
 0x300   : > { %979 = vmax.xlane.f32.xlu1 %v978_v14  ;;  %v1949_v14 = vld [vmem:[%s3370_s1 + $0x18] sm:$0xff]  }
 0x301   : > { %1803 = vmatmul.mubr.msk.bf16.gmra.mrb[12].mxu0 %vm397_vm0, %v1949_v14 }
 0x302   : > { %485 = vmatprep.mubr.bf16.mxu0 %v3422_v0 }
 0x304   : > { %v2722_v38 = vpop.f32.mrb[60].mxu1 }
 0x305   : > { %3420 = vst [vmem:[#allocation26_spill] sm:$0xff] %v2722_v38  ;;  %v2724_v35 = vpop.f32.mrb[61].mxu1 }
 0x306   : > { %3421 = vst [vmem:[#allocation27_spill] sm:$0xff] %v2724_v35  ;;  %v984_v57 = vmax.f32 %v2722_v38, %v2724_v35  ;;  %v2728_v51 = vpop.f32.mrb[62].mxu1  ;;  %v1950_v35 = vld [vmem:[%s3370_s1 + $0x20] sm:$0xff]  }
 0x307   : > { %v2730_v41 = vpop.f32.mrb[63].mxu1 }
 0x308   : > { %985 = vmax.xlane.f32.xlu1 %v984_v57 }
 0x309   : > { %1804 = vmatmul.mubr.msk.bf16.gmra.mrb[16].mxu0 %vm397_vm0, %v1950_v35 }
 0x31d   : > { %v896_v38 = vpop.xlane.xlu0 %895 }
 0x31e   : > { %v990_v57 = vsub.f32 %v2532_v42, %v896_v38  ;;  %v991_v63 = vsub.f32 %v2534_v43, %v896_v38 }
 0x320   : > { %v1054_v8 = vmul.f32 1.442695, %v990_v57  ;;  %v1056_v32 = vmul.f32 1.442695, %v991_v63 }
 0x321   : > { %v899_v26 = vpop.xlane.xlu0 %898 }
 0x322   : > { %1951 = vpow2.f32 %v1054_v8  ;;  %v992_v23 = vsub.f32 %v2536_v44, %v899_v26  ;;  %v993_v14 = vsub.f32 %v2540_v46, %v899_v26 }
 0x323   : > { %1953 = vpow2.f32 %v1056_v32 }
 0x324   : > { %v1058_v0 = vmul.f32 1.442695, %v992_v23  ;;  %v1060_v17 = vmul.f32 1.442695, %v993_v14 }
 0x325   : > { %v902_v11 = vpop.xlane.xlu0 %901 }
 0x326   : > { %1955 = vpow2.f32 %v1058_v0  ;;  %v994_v35 = vsub.f32 %v2544_v48, %v902_v11  ;;  %v995_v6 = vsub.f32 %v2546_v49, %v902_v11 }
 0x327   : > { %1957 = vpow2.f32 %v1060_v17 }
 0x328   : > { %v1062_v42 = vmul.f32 1.442695, %v994_v35  ;;  %v1064_v43 = vmul.f32 1.442695, %v995_v6 }
 0x329   : > { %v905_v38 = vpop.xlane.xlu0 %904 }
 0x32a   : > { %1959 = vpow2.f32 %v1062_v42  ;;  %v996_v63 = vsub.f32 %v2548_v50, %v905_v38  ;;  %v997_v44 = vsub.f32 %v2552_v52, %v905_v38 }
 0x32b   : > { %1961 = vpow2.f32 %v1064_v43 }
 0x32c   : > { %v2751_v46 = vpop.eup %1951  ;;  %v1066_v23 = vmul.f32 1.442695, %v996_v63  ;;  %v1068_v26 = vmul.f32 1.442695, %v997_v44 }
 0x32d   : > { %v2753_v32 = vpop.eup %1953  ;;  %v908_v8 = vpop.xlane.xlu0 %907 }
 0x32e   : > { %1963 = vpow2.f32 %v1066_v23  ;;  %v998_v48 = vsub.f32 %v2556_v54, %v908_v8  ;;  %v999_v49 = vsub.f32 %v2558_v55, %v908_v8  ;;  %v1182_v6 = vadd.f32 %v2753_v32, %v2751_v46 }
 0x32f   : > { %1965 = vpow2.f32 %v1068_v26 }
 0x330   : > { %v2759_v50 = vpop.eup %1955  ;;  %v1070_v52 = vmul.f32 1.442695, %v998_v48  ;;  %v1072_v11 = vmul.f32 1.442695, %v999_v49  ;;  %1183 = vadd.xlane.f32.xlu0 %v1182_v6 }
 0x331   : > { %v2761_v17 = vpop.eup %1957  ;;  %v911_v57 = vpop.xlane.xlu0 %910 }
 0x332   : > { %1967 = vpow2.f32 %v1070_v52  ;;  %v1000_v14 = vsub.f32 %v2560_v56, %v911_v57  ;;  %v1001_v0 = vsub.f32 %v2564_v58, %v911_v57  ;;  %v1185_v54 = vadd.f32 %v2761_v17, %v2759_v50 }
 0x333   : > { %1969 = vpow2.f32 %v1072_v11 }
 0x334   : > { %v2767_v55 = vpop.eup %1959  ;;  %v1074_v35 = vmul.f32 1.442695, %v1000_v14  ;;  %v1076_v42 = vmul.f32 1.442695, %v1001_v0  ;;  %1186 = vadd.xlane.f32.xlu0 %v1185_v54 }
 0x335   : > { %v2769_v43 = vpop.eup %1961  ;;  %v914_v38 = vpop.xlane.xlu0 %913 }
 0x336   : > { %1971 = vpow2.f32 %v1074_v35  ;;  %v1002_v63 = vsub.f32 %v2568_v60, %v914_v38  ;;  %v1003_v44 = vsub.f32 %v2570_v61, %v914_v38  ;;  %v1188_v56 = vadd.f32 %v2769_v43, %v2767_v55 }
 0x337   : > { %1973 = vpow2.f32 %v1076_v42 }
 0x338   : > { %v2775_v58 = vpop.eup %1963  ;;  %v1078_v23 = vmul.f32 1.442695, %v1002_v63  ;;  %v1080_v26 = vmul.f32 1.442695, %v1003_v44  ;;  %1189 = vadd.xlane.f32.xlu0 %v1188_v56 }
 0x339   : > { %v2777_v8 = vpop.eup %1965  ;;  %v917_v48 = vpop.xlane.xlu0 %916 }
 0x33a   : > { %1975 = vpow2.f32 %v1078_v23  ;;  %v1004_v49 = vsub.f32 %v2572_v62, %v917_v48  ;;  %v1005_v6 = vsub.f32 %v2576_v1, %v917_v48  ;;  %v1191_v60 = vadd.f32 %v2777_v8, %v2775_v58 }
 0x33b   : > { %1977 = vpow2.f32 %v1080_v26 }
 0x33c   : > { %v2783_v61 = vpop.eup %1967  ;;  %v1082_v52 = vmul.f32 1.442695, %v1004_v49  ;;  %v1084_v11 = vmul.f32 1.442695, %v1005_v6  ;;  %1192 = vadd.xlane.f32.xlu0 %v1191_v60 }
 0x33d   : > { %v2785_v57 = vpop.eup %1969  ;;  %v920_v14 = vpop.xlane.xlu1 %919 }
 0x33e   : > { %1979 = vpow2.f32 %v1082_v52  ;;  %v1006_v0 = vsub.f32 %v2580_v3, %v920_v14  ;;  %v1007_v54 = vsub.f32 %v2582_v4, %v920_v14  ;;  %v1194_v62 = vadd.f32 %v2785_v57, %v2783_v61 }
 0x33f   : > { %1981 = vpow2.f32 %v1084_v11  ;;  %v923_v1 = vpop.xlane.xlu0 %922  ;;  %v3423_v14 = vmax.f32 %v2716_v20, %v2718_v29 }
 0x340   : > { %v2791_v35 = vpop.eup %1971  ;;  %v1086_v42 = vmul.f32 1.442695, %v1006_v0  ;;  %v1088_v38 = vmul.f32 1.442695, %v1007_v54  ;;  %v1008_v63 = vsub.f32 %v2584_v5, %v923_v1  ;;  %v1009_v44 = vsub.f32 %v2588_v7, %v923_v1  ;;  %1195 = vadd.xlane.f32.xlu0 %v1194_v62 }
 0x341   : > { %v2795_v56 = vpop.eup %1973 }
 0x342   : > { %1983 = vpow2.f32 %v1086_v42  ;;  %v1090_v3 = vmul.f32 1.442695, %v1008_v63  ;;  %v1092_v23 = vmul.f32 1.442695, %v1009_v44  ;;  %v1197_v4 = vadd.f32 %v2795_v56, %v2791_v35 }
 0x343   : > { %1985 = vpow2.f32 %v1088_v38 }
 0x344   : > { %v2799_v26 = vpop.eup %1975  ;;  %1987 = vpow2.f32 %v1090_v3  ;;  %1198 = vadd.xlane.f32.xlu0 %v1197_v4 }
 0x345   : > { %v2801_v48 = vpop.eup %1977  ;;  %1989 = vpow2.f32 %v1092_v23  ;;  %v926_v5 = vpop.xlane.xlu0 %925 }
 0x346   : > { %v1010_v7 = vsub.f32 %v2592_v9, %v926_v5  ;;  %v1011_v49 = vsub.f32 %v2594_v10, %v926_v5  ;;  %v1200_v6 = vadd.f32 %v2801_v48, %v2799_v26 }
 0x348   : > { %v2807_v60 = vpop.eup %1979  ;;  %v1094_v52 = vmul.f32 1.442695, %v1010_v7  ;;  %v1096_v11 = vmul.f32 1.442695, %v1011_v49  ;;  %982 = vmax.xlane.f32.xlu0 %v3423_v14  ;;  %1201 = vadd.xlane.f32.xlu1 %v1200_v6  ;;  %v3424_v49 = vmax.f32 %v2728_v51, %v2730_v41 }
 0x349   : > { %v2812_v0 = vpop.eup %1981  ;;  %v929_v54 = vpop.xlane.xlu0 %928 }
 0x34a   : > { %1991 = vpow2.f32 %v1094_v52  ;;  %v1012_v9 = vsub.f32 %v2598_v12, %v929_v54  ;;  %v1013_v10 = vsub.f32 %v2600_v13, %v929_v54  ;;  %v1203_v62 = vadd.f32 %v2812_v0, %v2807_v60 }
 0x34b   : > { %1993 = vpow2.f32 %v1096_v11 }
 0x34c   : > { %v2818_v1 = vpop.eup %1983  ;;  %v1098_v42 = vmul.f32 1.442695, %v1012_v9  ;;  %v1100_v38 = vmul.f32 1.442695, %v1013_v10  ;;  %1204 = vadd.xlane.f32.xlu0 %v1203_v62 }
 0x34d   : > { %v2820_v63 = vpop.eup %1985  ;;  %v932_v44 = vpop.xlane.xlu0 %931 }
 0x34e   : > { %v2822_v3 = vpop.eup %1987  ;;  %1995 = vpow2.f32 %v1098_v42  ;;  %v1014_v23 = vsub.f32 %v2604_v15, %v932_v44  ;;  %v1015_v12 = vsub.f32 %v2606_v16, %v932_v44  ;;  %v1206_v13 = vadd.f32 %v2820_v63, %v2818_v1 }
 0x34f   : > { %v2828_v4 = vpop.eup %1989  ;;  %1997 = vpow2.f32 %v1100_v38 }
 0x350   : > { %v1102_v5 = vmul.f32 1.442695, %v1014_v23  ;;  %v1104_v7 = vmul.f32 1.442695, %v1015_v12  ;;  %988 = vmax.xlane.f32.xlu0 %v3424_v49  ;;  %1207 = vadd.xlane.f32.xlu1 %v1206_v13  ;;  %v1209_v16 = vadd.f32 %v2828_v4, %v2822_v3 }
 0x351   : > { %v935_v6 = vpop.xlane.xlu0 %934 }
 0x352   : > { %1999 = vpow2.f32 %v1102_v5  ;;  %v1016_v52 = vsub.f32 %v2610_v18, %v935_v6  ;;  %v1017_v15 = vsub.f32 %v2612_v19, %v935_v6 }
 0x353   : > { %2001 = vpow2.f32 %v1104_v7 }
 0x354   : > { %v2837_v11 = vpop.eup %1991  ;;  %v1106_v14 = vmul.f32 1.442695, %v1016_v52  ;;  %v1108_v54 = vmul.f32 1.442695, %v1017_v15  ;;  %1210 = vadd.xlane.f32.xlu0 %v1209_v16 }
 0x355   : > { %v2839_v9 = vpop.eup %1993  ;;  %v938_v10 = vpop.xlane.xlu0 %937 }
 0x356   : > { %2003 = vpow2.f32 %v1106_v14  ;;  %v1018_v62 = vsub.f32 %v2616_v21, %v938_v10  ;;  %v1019_v42 = vsub.f32 %v2618_v22, %v938_v10  ;;  %v1212_v18 = vadd.f32 %v2839_v9, %v2837_v11 }
 0x357   : > { %2005 = vpow2.f32 %v1108_v54 }
 0x358   : > { %v2845_v19 = vpop.eup %1995  ;;  %v1110_v38 = vmul.f32 1.442695, %v1018_v62  ;;  %v1112_v44 = vmul.f32 1.442695, %v1019_v42  ;;  %1213 = vadd.xlane.f32.xlu1 %v1212_v18 }
 0x359   : > { %v2847_v23 = vpop.eup %1997  ;;  %v941_v12 = vpop.xlane.xlu0 %940 }
 0x35a   : > { %2007 = vpow2.f32 %v1110_v38  ;;  %v1020_v13 = vsub.f32 %v2622_v24, %v941_v12  ;;  %v1021_v5 = vsub.f32 %v2624_v25, %v941_v12  ;;  %v1215_v21 = vadd.f32 %v2847_v23, %v2845_v19 }
 0x35b   : > { %2009 = vpow2.f32 %v1112_v44 }
 0x35c   : > { %v2853_v22 = vpop.eup %1999  ;;  %v1114_v7 = vmul.f32 1.442695, %v1020_v13  ;;  %v1116_v49 = vmul.f32 1.442695, %v1021_v5  ;;  %1216 = vadd.xlane.f32.xlu0 %v1215_v21 }
 0x35d   : > { %v2855_v6 = vpop.eup %2001  ;;  %v944_v52 = vpop.xlane.xlu0 %943 }
 0x35e   : > { %2011 = vpow2.f32 %v1114_v7  ;;  %v1022_v15 = vsub.f32 %v2628_v27, %v944_v52  ;;  %v1023_v16 = vsub.f32 %v2630_v28, %v944_v52  ;;  %v1218_v24 = vadd.f32 %v2855_v6, %v2853_v22 }
 0x35f   : > { %2013 = vpow2.f32 %v1116_v49 }
 0x360   : > { %v2861_v25 = vpop.eup %2003  ;;  %v1118_v14 = vmul.f32 1.442695, %v1022_v15  ;;  %v1120_v54 = vmul.f32 1.442695, %v1023_v16  ;;  %1219 = vadd.xlane.f32.xlu1 %v1218_v24 }
 0x361   : > { %v2863_v10 = vpop.eup %2005  ;;  %v947_v62 = vpop.xlane.xlu0 %946 }
 0x362   : > { %2015 = vpow2.f32 %v1118_v14  ;;  %v1024_v42 = vsub.f32 %v2634_v30, %v947_v62  ;;  %v1025_v18 = vsub.f32 %v2636_v31, %v947_v62  ;;  %v1221_v27 = vadd.f32 %v2863_v10, %v2861_v25 }
 0x363   : > { %2017 = vpow2.f32 %v1120_v54 }
 0x364   : > { %v2869_v28 = vpop.eup %2007  ;;  %v1122_v38 = vmul.f32 1.442695, %v1024_v42  ;;  %v1124_v44 = vmul.f32 1.442695, %v1025_v18  ;;  %1222 = vadd.xlane.f32.xlu0 %v1221_v27 }
 0x365   : > { %v2871_v12 = vpop.eup %2009  ;;  %v950_v13 = vpop.xlane.xlu0 %949 }
 0x366   : > { %2019 = vpow2.f32 %v1122_v38  ;;  %v1026_v5 = vsub.f32 %v2640_v33, %v950_v13  ;;  %v1027_v21 = vsub.f32 %v2642_v34, %v950_v13  ;;  %v1224_v30 = vadd.f32 %v2871_v12, %v2869_v28 }
 0x367   : > { %2021 = vpow2.f32 %v1124_v44 }
 0x368   : > { %v2877_v31 = vpop.eup %2011  ;;  %v1126_v7 = vmul.f32 1.442695, %v1026_v5  ;;  %v1128_v49 = vmul.f32 1.442695, %v1027_v21  ;;  %1225 = vadd.xlane.f32.xlu1 %v1224_v30 }
 0x369   : > { %v2879_v52 = vpop.eup %2013  ;;  %v953_v15 = vpop.xlane.xlu0 %952 }
 0x36a   : > { %2023 = vpow2.f32 %v1126_v7  ;;  %v1028_v16 = vsub.f32 %v2646_v36, %v953_v15  ;;  %v1029_v24 = vsub.f32 %v2648_v37, %v953_v15  ;;  %v1227_v33 = vadd.f32 %v2879_v52, %v2877_v31 }
 0x36b   : > { %2025 = vpow2.f32 %v1128_v49 }
 0x36c   : > { %v2885_v34 = vpop.eup %2015  ;;  %v1130_v14 = vmul.f32 1.442695, %v1028_v16  ;;  %v1132_v54 = vmul.f32 1.442695, %v1029_v24  ;;  %1228 = vadd.xlane.f32.xlu0 %v1227_v33 }
 0x36d   : > { %v2887_v62 = vpop.eup %2017  ;;  %v956_v42 = vpop.xlane.xlu0 %955 }
 0x36e   : > { %2027 = vpow2.f32 %v1130_v14  ;;  %v1030_v18 = vsub.f32 %v2652_v39, %v956_v42  ;;  %v1031_v27 = vsub.f32 %v2654_v40, %v956_v42  ;;  %v1230_v36 = vadd.f32 %v2887_v62, %v2885_v34 }
 0x36f   : > { %2029 = vpow2.f32 %v1132_v54 }
 0x370   : > { %v2893_v37 = vpop.eup %2019  ;;  %v1134_v38 = vmul.f32 1.442695, %v1030_v18  ;;  %v1136_v44 = vmul.f32 1.442695, %v1031_v27  ;;  %1231 = vadd.xlane.f32.xlu1 %v1230_v36  ;;  %v3425_v36 = vld [vmem:[#allocation15_spill] sm:$0xff] }
 0x371   : > { %v2895_v13 = vpop.eup %2021  ;;  %v959_v5 = vpop.xlane.xlu0 %958 }
 0x372   : > { %2031 = vpow2.f32 %v1134_v38  ;;  %v1032_v21 = vsub.f32 %v2658_v45, %v959_v5  ;;  %v1033_v30 = vsub.f32 %v2660_v47, %v959_v5  ;;  %v1233_v39 = vadd.f32 %v2895_v13, %v2893_v37 }
 0x373   : > { %2033 = vpow2.f32 %v1136_v44 }
 0x374   : > { %v2901_v40 = vpop.eup %2023  ;;  %v1138_v7 = vmul.f32 1.442695, %v1032_v21  ;;  %v1140_v49 = vmul.f32 1.442695, %v1033_v30  ;;  %1234 = vadd.xlane.f32.xlu0 %v1233_v39  ;;  %v3426_v39 = vld [vmem:[#allocation16_spill] sm:$0xff] }
 0x375   : > { %v2903_v15 = vpop.eup %2025  ;;  %v962_v16 = vpop.xlane.xlu0 %961 }
 0x376   : > { %2035 = vpow2.f32 %v1138_v7  ;;  %v1034_v24 = vsub.f32 %v2664_v53, %v962_v16  ;;  %v1035_v33 = vsub.f32 %v2669_v59, %v962_v16  ;;  %v1236_v45 = vadd.f32 %v2903_v15, %v2901_v40 }
 0x377   : > { %2037 = vpow2.f32 %v1140_v49  ;;  %v3427_v49 = vld [vmem:[#allocation17_spill] sm:$0xff] }
 0x378   : > { %v2909_v47 = vpop.eup %2027  ;;  %v1142_v14 = vmul.f32 1.442695, %v1034_v24  ;;  %v1144_v54 = vmul.f32 1.442695, %v1035_v33  ;;  %1237 = vadd.xlane.f32.xlu1 %v1236_v45 }
 0x379   : > { %v2911_v42 = vpop.eup %2029  ;;  %v965_v18 = vpop.xlane.xlu0 %964 }
 0x37a   : > { %2039 = vpow2.f32 %v1142_v14  ;;  %v1036_v27 = vsub.f32 %v2673_v2, %v965_v18  ;;  %v1037_v38 = vsub.f32 %v3425_v36, %v965_v18  ;;  %v1239_v53 = vadd.f32 %v2911_v42, %v2909_v47  ;;  %v3430_v18 = vld [vmem:[#allocation18_spill] sm:$0xff]  ;;  %v3431_v36 = vld [vmem:[#allocation19_spill] sm:$0xff] }
 0x37b   : > { %2041 = vpow2.f32 %v1144_v54 }
 0x37c   : > { %v2917_v59 = vpop.eup %2031  ;;  %v1146_v44 = vmul.f32 1.442695, %v1036_v27  ;;  %v1148_v5 = vmul.f32 1.442695, %v1037_v38  ;;  %1240 = vadd.xlane.f32.xlu0 %v1239_v53 }
 0x37d   : > { %v2919_v21 = vpop.eup %2033  ;;  %v968_v30 = vpop.xlane.xlu0 %967 }
 0x37e   : > { %2043 = vpow2.f32 %v1146_v44  ;;  %v1038_v7 = vsub.f32 %v3426_v39, %v968_v30  ;;  %v1039_v16 = vsub.f32 %v3427_v49, %v968_v30  ;;  %v1242_v2 = vadd.f32 %v2919_v21, %v2917_v59  ;;  %v3433_v49 = vld [vmem:[#allocation20_spill] sm:$0xff] }
 0x37f   : > { %2045 = vpow2.f32 %v1148_v5 }
 0x380   : > { %v2925_v24 = vpop.eup %2035  ;;  %v1150_v33 = vmul.f32 1.442695, %v1038_v7  ;;  %v1152_v45 = vmul.f32 1.442695, %v1039_v16  ;;  %1243 = vadd.xlane.f32.xlu1 %v1242_v2  ;;  %v3434_v2 = vld [vmem:[#allocation21_spill] sm:$0xff] }
 0x381   : > { %3428 = vst [vmem:[#allocation15_spill] sm:$0xff] %v2925_v24  ;;  %v2927_v14 = vpop.eup %2037  ;;  %v971_v54 = vpop.xlane.xlu0 %970 }
 0x382   : > { %3429 = vst [vmem:[#allocation16_spill] sm:$0xff] %v2927_v14  ;;  %2047 = vpow2.f32 %v1150_v33  ;;  %v1040_v27 = vsub.f32 %v3430_v18, %v971_v54  ;;  %v1041_v38 = vsub.f32 %v3431_v36, %v971_v54  ;;  %v1245_v53 = vadd.f32 %v2927_v14, %v2925_v24 }
 0x383   : > { %2049 = vpow2.f32 %v1152_v45 }
 0x384   : > { %v2933_v44 = vpop.eup %2039  ;;  %v1154_v5 = vmul.f32 1.442695, %v1040_v27  ;;  %v1156_v30 = vmul.f32 1.442695, %v1041_v38  ;;  %1246 = vadd.xlane.f32.xlu0 %v1245_v53  ;;  %v3437_v53 = vld [vmem:[#allocation22_spill] sm:$0xff] }
 0x385   : > { %3432 = vst [vmem:[#allocation17_spill] sm:$0xff] %v2933_v44  ;;  %v2935_v39 = vpop.eup %2041  ;;  %v974_v7 = vpop.xlane.xlu0 %973 }
 0x386   : > { %2051 = vpow2.f32 %v1154_v5  ;;  %v1042_v16 = vsub.f32 %v3433_v49, %v974_v7  ;;  %v1043_v33 = vsub.f32 %v3434_v2, %v974_v7  ;;  %v1248_v54 = vadd.f32 %v2935_v39, %v2933_v44  ;;  %v3438_v5 = vld [vmem:[#allocation23_spill] sm:$0xff] }
 0x387   : > { %2053 = vpow2.f32 %v1156_v30 }
 0x388   : > { %v2941_v18 = vpop.eup %2043  ;;  %v1158_v45 = vmul.f32 1.442695, %v1042_v16  ;;  %v1160_v36 = vmul.f32 1.442695, %v1043_v33  ;;  %1249 = vadd.xlane.f32.xlu1 %v1248_v54 }
 0x389   : > { %3435 = vst [vmem:[#allocation18_spill] sm:$0xff] %v2941_v18  ;;  %v2943_v27 = vpop.eup %2045  ;;  %v977_v38 = vpop.xlane.xlu0 %976 }
 0x38a   : > { %3436 = vst [vmem:[#allocation19_spill] sm:$0xff] %v2943_v27  ;;  %2055 = vpow2.f32 %v1158_v45  ;;  %v1044_v24 = vsub.f32 %v3437_v53, %v977_v38  ;;  %v1045_v14 = vsub.f32 %v3438_v5, %v977_v38  ;;  %v1251_v7 = vadd.f32 %v2943_v27, %v2941_v18  ;;  %v3450_v18 = vld [vmem:[#allocation27_spill] sm:$0xff] }
 0x38b   : > { %2057 = vpow2.f32 %v1160_v36 }
 0x38c   : > { %v2949_v49 = vpop.eup %2047  ;;  %v1162_v30 = vmul.f32 1.442695, %v1044_v24  ;;  %v1164_v2 = vmul.f32 1.442695, %v1045_v14  ;;  %1252 = vadd.xlane.f32.xlu0 %v1251_v7 }
 0x38d   : > { %3439 = vst [vmem:[#allocation20_spill] sm:$0xff] %v2949_v49  ;;  %v2951_v16 = vpop.eup %2049 }
 0x38e   : > { %3440 = vst [vmem:[#allocation21_spill] sm:$0xff] %v2951_v16  ;;  %2059 = vpow2.f32 %v1162_v30  ;;  %v1254_v33 = vadd.f32 %v2951_v16, %v2949_v49  ;;  %v316_v30 = vld [vmem:[%s3371_s2 + $0x20] sm:$0xff] }
 0x38f   : > { %2061 = vpow2.f32 %v1164_v2  ;;  %v980_v2 = vpop.xlane.xlu1 %979 }
 0x390   : > { %v2955_v54 = vpop.eup %2051  ;;  %1255 = vadd.xlane.f32.xlu1 %v1254_v33  ;;  %v3447_v33 = vld [vmem:[#allocation24_spill] sm:$0xff] }
 0x391   : > { %3441 = vst [vmem:[#allocation22_spill] sm:$0xff] %v2955_v54  ;;  %v2957_v45 = vpop.eup %2053 }
 0x392   : > { %3442 = vst [vmem:[#allocation23_spill] sm:$0xff] %v2957_v45  ;;  %v1257_v36 = vadd.f32 %v2957_v45, %v2955_v54  ;;  %v3448_v54 = vld [vmem:[#allocation25_spill] sm:$0xff] }
 0x393   : > { %v1047_v45 = vsub.f32 %v3448_v54, %v980_v2 }
 0x394   : > { %v2961_v38 = vpop.eup %2055  ;;  %1258 = vadd.xlane.f32.xlu0 %v1257_v36  ;;  %v1046_v36 = vsub.f32 %v3447_v33, %v980_v2 }
 0x395   : > { %3443 = vst [vmem:[#allocation28_spill] sm:$0xff] %v2961_v38  ;;  %v2963_v24 = vpop.eup %2057  ;;  %v1168_v49 = vmul.f32 1.442695, %v1047_v45 }
 0x396   : > { %3444 = vst [vmem:[#allocation29_spill] sm:$0xff] %v2963_v24  ;;  %v1260_v14 = vadd.f32 %v2963_v24, %v2961_v38  ;;  %v986_v38 = vpop.xlane.xlu1 %985  ;;  %v1166_v24 = vmul.f32 1.442695, %v1046_v36 }
 0x397   : > { %v1051_v27 = vsub.f32 %v3450_v18, %v986_v38 }
 0x398   : > { %v2967_v53 = vpop.eup %2059  ;;  %1261 = vadd.xlane.f32.xlu1 %v1260_v14  ;;  %v3449_v14 = vld [vmem:[#allocation26_spill] sm:$0xff]  ;;  %2063 = vpow2.f32 %v1166_v24 }
 0x399   : > { %3445 = vst [vmem:[#allocation30_spill] sm:$0xff] %v2967_v53  ;;  %v2969_v5 = vpop.eup %2061  ;;  %v1050_v16 = vsub.f32 %v3449_v14, %v986_v38  ;;  %2065 = vpow2.f32 %v1168_v49  ;;  %v1176_v33 = vmul.f32 1.442695, %v1051_v27 }
 0x39a   : > { %3446 = vst [vmem:[#allocation31_spill] sm:$0xff] %v2969_v5  ;;  %v1263_v7 = vadd.f32 %v2969_v5, %v2967_v53  ;;  %v2980_v5 = vpop.f32.mrb[4].mxu0 }
 0x39b   : > { %3451 = vst [vmem:[#allocation24_spill] sm:$0xff] %v2980_v5 }
 0x39c   : > { %1264 = vadd.xlane.f32.xlu0 %v1263_v7  ;;  %v1174_v7 = vmul.f32 1.442695, %v1050_v16 }
 0x3a2   : > { %v2993_v16 = vpop.eup %2063 }
 0x3a3   : > { %v2995_v38 = vpop.eup %2065 }
 0x3a9   : > { %344 = vperm.xlu1 %1945, %v316_v30   ;;  %v2982_v30 = vpop.f32.mrb[5].mxu0 }
 0x3aa   : > { %3452 = vst [vmem:[#allocation25_spill] sm:$0xff] %v2982_v30  ;;  %v2984_v44 = vpop.f32.mrb[6].mxu0 }
 0x3ab   : > { %v2986_v54 = vpop.f32.mrb[7].mxu0 }
 0x3ac   : > { %3453 = vst [vmem:[#allocation26_spill] sm:$0xff] %v2986_v54  ;;  %v2988_v2 = vpop.f32.mrb[8].mxu0 }
 0x3ad   : > { %v2990_v18 = vpop.f32.mrb[9].mxu0 }
 0x3bd   : > { %v1184_v53 = vpop.xlane.xlu0 %1183 }
 0x3be   : > { %2067 = vrcp.f32 %v1184_v53 }
 0x3bf   : > { %2069 = vpow2.f32 %v1174_v7  ;;  %v1266_v7 = vadd.f32 %v2995_v38, %v2993_v16 }
 0x3c1   : > { %v1187_v45 = vpop.xlane.xlu0 %1186 }
 0x3c2   : > { %2071 = vrcp.f32 %v1187_v45 }
 0x3c3   : > { %2073 = vpow2.f32 %v1176_v33 }
 0x3c5   : > { %v1190_v49 = vpop.xlane.xlu0 %1189 }
 0x3c6   : > { %2075 = vrcp.f32 %v1190_v49 }
 0x3c8   : > { %v2068_v27 = vpop.eup %2067 }
 0x3c9   : > { %v1193_v24 = vpop.xlane.xlu0 %1192  ;;  %v1311_v53 = vmul.f32 %v2068_v27, %v2753_v32  ;;  %v1310_v36 = vmul.f32 %v2068_v27, %v2751_v46  ;;  %v2999_v14 = vpop.eup %2069 }
 0x3ca   : > { %2077 = vrcp.f32 %v1193_v24 }
 0x3cb   : > { %1558 = vst [vmem:[%s3003_s19 + $0x8] sm:$0xff] %v1311_v53  ;;  %1557 = vst [vmem:[%s3003_s19] sm:$0xff] %v1310_v36 }
 0x3cc   : > { %v2072_v33 = vpop.eup %2071 }
 0x3cd   : > { %v3007_v45 = vpop.eup %2073  ;;  %v1196_v32 = vpop.xlane.xlu0 %1195  ;;  %1267 = vadd.xlane.f32.xlu1 %v1266_v7  ;;  %v1313_v46 = vmul.f32 %v2072_v33, %v2761_v17  ;;  %v1312_v49 = vmul.f32 %v2072_v33, %v2759_v50 }
 0x3ce   : > { %2079 = vrcp.f32 %v1196_v32  ;;  %v1272_v5 = vadd.f32 %v3007_v45, %v2999_v14 }
 0x3cf   : > { %v1383_v27 = vpack.c.bf16 %v1313_v46, %v1311_v53  ;;  %1560 = vst [vmem:[%s3003_s19 + $0x18] sm:$0xff] %v1313_v46  ;;  %v1382_v24 = vpack.c.bf16 %v1312_v49, %v1310_v36  ;;  %1559 = vst [vmem:[%s3003_s19 + $0x10] sm:$0xff] %v1312_v49 }
 0x3d0   : > { %v2076_v30 = vpop.eup %2075 }
 0x3d1   : > { %1414 = vmatprep.subr.bf16.mxu0 %v1383_v27  ;;  %1839 = vmatprep.subr.bf16.mxu1 %v1383_v27  ;;  %v1199_v54 = vpop.xlane.xlu0 %1198  ;;  %v1315_v7 = vmul.f32 %v2076_v30, %v2769_v43  ;;  %v1314_v17 = vmul.f32 %v2076_v30, %v2767_v55 }
 0x3d2   : > { %2081 = vrcp.f32 %v1199_v54  ;;  %1273 = vadd.xlane.f32.xlu1 %v1272_v5  ;;  %1415 = vmatpush1.bf16.xpose.msra.mxu0 %v1382_v24 }
 0x3d3   : > { %1855 = vmatpush1.bf16.xpose.msra.mxu1 %v1382_v24  ;;  %1562 = vst [vmem:[%s3003_s19 + $0x28] sm:$0xff] %v1315_v7  ;;  %1561 = vst [vmem:[%s3003_s19 + $0x20] sm:$0xff] %v1314_v17 }
 0x3d4   : > { %v2078_v50 = vpop.eup %2077 }
 0x3d5   : > { %v983_v53 = vpop.xlane.xlu0 %982  ;;  %v1202_v36 = vpop.xlane.xlu1 %1201  ;;  %v1317_v33 = vmul.f32 %v2078_v50, %v2777_v8  ;;  %v1316_v32 = vmul.f32 %v2078_v50, %v2775_v58 }
 0x3d6   : > { %v1048_v46 = vsub.f32 %v2716_v20, %v983_v53  ;;  %v1049_v43 = vsub.f32 %v2718_v29, %v983_v53  ;;  %2083 = vrcp.f32 %v1202_v36 }
 0x3d7   : > { %v1385_v55 = vpack.c.bf16 %v1317_v33, %v1315_v7  ;;  %1564 = vst [vmem:[%s3003_s19 + $0x38] sm:$0xff] %v1317_v33  ;;  %v1384_v5 = vpack.c.bf16 %v1316_v32, %v1314_v17  ;;  %1563 = vst [vmem:[%s3003_s19 + $0x30] sm:$0xff] %v1316_v32 }
 0x3d8   : > { %v2080_v30 = vpop.eup %2079  ;;  %v1170_v54 = vmul.f32 1.442695, %v1048_v46  ;;  %v1172_v49 = vmul.f32 1.442695, %v1049_v43  ;;  %v3038_v46 = vpop.f32.mrb[10].mxu0 }
 0x3d9   : > { %1416 = vmatprep.subr.bf16.mxu0 %v1385_v55  ;;  %1840 = vmatprep.subr.bf16.mxu1 %v1385_v55  ;;  %v1205_v27 = vpop.xlane.xlu0 %1204  ;;  %v1319_v8 = vmul.f32 %v2080_v30, %v2785_v57  ;;  %v1318_v58 = vmul.f32 %v2080_v30, %v2783_v61  ;;  %v3042_v43 = vpop.f32.mrb[11].mxu0 }
 0x3da   : > { %2085 = vpow2.f32 %v1170_v54  ;;  %1417 = vmatpush1.bf16.xpose.msra.mxu0 %v1384_v5  ;;  %v3044_v55 = vpop.f32.mrb[12].mxu0 }
 0x3db   : > { %2087 = vpow2.f32 %v1172_v49  ;;  %1856 = vmatpush1.bf16.xpose.msra.mxu1 %v1384_v5  ;;  %1566 = vst [vmem:[%s3003_s19 + $0x48] sm:$0xff] %v1319_v8  ;;  %1565 = vst [vmem:[%s3003_s19 + $0x40] sm:$0xff] %v1318_v58  ;;  %v3048_v5 = vpop.f32.mrb[13].mxu0 }
 0x3dc   : > { %v2082_v20 = vpop.eup %2081  ;;  %2089 = vrcp.f32 %v1205_v27 }
 0x3dd   : > { %v989_v29 = vpop.xlane.xlu0 %988  ;;  %v1208_v24 = vpop.xlane.xlu1 %1207  ;;  %v1321_v7 = vmul.f32 %v2082_v20, %v2795_v56  ;;  %v1320_v17 = vmul.f32 %v2082_v20, %v2791_v35  ;;  %v318_v56 = vld [vmem:[%s3371_s2 + $0x30] sm:$0xff] }
 0x3de   : > { %v1052_v57 = vsub.f32 %v2728_v51, %v989_v29  ;;  %v1053_v61 = vsub.f32 %v2730_v41, %v989_v29  ;;  %2091 = vrcp.f32 %v1208_v24 }
 0x3df   : > { %v1387_v50 = vpack.c.bf16 %v1321_v7, %v1319_v8  ;;  %1568 = vst [vmem:[%s3003_s19 + $0x58] sm:$0xff] %v1321_v7  ;;  %v1386_v53 = vpack.c.bf16 %v1320_v17, %v1318_v58  ;;  %1567 = vst [vmem:[%s3003_s19 + $0x50] sm:$0xff] %v1320_v17 }
 0x3e0   : > { %v2084_v36 = vpop.eup %2083  ;;  %v1178_v33 = vmul.f32 1.442695, %v1052_v57  ;;  %v1180_v32 = vmul.f32 1.442695, %v1053_v61  ;;  %v315_v57 = vld [vmem:[%s3371_s2 + $0x18] sm:$0xff] }
 0x3e1   : > { %1418 = vmatprep.subr.bf16.mxu0 %v1387_v50  ;;  %1841 = vmatprep.subr.bf16.mxu1 %v1387_v50  ;;  %v1211_v51 = vpop.xlane.xlu0 %1210  ;;  %v1323_v41 = vmul.f32 %v2084_v36, %v2801_v48  ;;  %v1322_v35 = vmul.f32 %v2084_v36, %v2799_v26  ;;  %v319_v26 = vld [vmem:[%s3371_s2 + $0x38] sm:$0xff]  ;;  %v3055_v48 = vpop.f32.mrb[14].mxu0 }
 0x3e2   : > { %2093 = vpow2.f32 %v1178_v33  ;;  %1419 = vmatpush1.bf16.xpose.msra.mxu0 %v1386_v53  ;;  %v3059_v27 = vpop.f32.mrb[15].mxu0 }
 0x3e3   : > { %2095 = vpow2.f32 %v1180_v32  ;;  %1857 = vmatpush1.bf16.xpose.msra.mxu1 %v1386_v53  ;;  %354 = vperm.xlu1 %1945, %v318_v56   ;;  %1570 = vst [vmem:[%s3003_s19 + $0x68] sm:$0xff] %v1323_v41  ;;  %1569 = vst [vmem:[%s3003_s19 + $0x60] sm:$0xff] %v1322_v35 }
 0x3e4   : > { %v3050_v30 = vpop.eup %2085  ;;  %2097 = vrcp.f32 %v1211_v51 }
 0x3e5   : > { %v3057_v54 = vpop.eup %2087  ;;  %v1214_v49 = vpop.xlane.xlu1 %1213 }
 0x3e6   : > { %v2090_v8 = vpop.eup %2089  ;;  %2099 = vrcp.f32 %v1214_v49  ;;  %v1269_v58 = vadd.f32 %v3057_v54, %v3050_v30 }
 0x3e7   : > { %359 = vperm.xlu1 %1945, %v319_v26   ;;  %v1325_v20 = vmul.f32 %v2090_v8, %v2812_v0  ;;  %v1324_v29 = vmul.f32 %v2090_v8, %v2807_v60  ;;  %v3076_v0 = vpop.f32.mrb[16].mxu0 }
 0x3e8   : > { %v2092_v24 = vpop.eup %2091  ;;  %1270 = vadd.xlane.f32.xlu0 %v1269_v58 }
 0x3e9   : > { %v1217_v7 = vpop.xlane.xlu0 %1216  ;;  %v1389_v17 = vpack.c.bf16 %v1325_v20, %v1323_v41  ;;  %1572 = vst [vmem:[%s3003_s19 + $0x78] sm:$0xff] %v1325_v20  ;;  %v1388_v61 = vpack.c.bf16 %v1324_v29, %v1322_v35  ;;  %1571 = vst [vmem:[%s3003_s19 + $0x70] sm:$0xff] %v1324_v29  ;;  %v1327_v50 = vmul.f32 %v2092_v24, %v2820_v63  ;;  %v3083_v63 = vpop.f32.mrb[17].mxu0 }
 0x3ea   : > { %v1326_v53 = vmul.f32 %v2092_v24, %v2818_v1  ;;  %2101 = vrcp.f32 %v1217_v7  ;;  %v321_v1 = vld [vmem:[%s3371_s2 + $0x48] sm:$0xff]  ;;  %v3087_v51 = vpop.f32.mrb[18].mxu0 }
 0x3eb   : > { %1420 = vmatprep.subr.bf16.mxu0 %v1389_v17  ;;  %1842 = vmatprep.subr.bf16.mxu1 %v1389_v17  ;;  %1574 = vst [vmem:[%s3003_s19 + $0x88] sm:$0xff] %v1327_v50  ;;  %v3091_v26 = vpop.f32.mrb[19].mxu0 }
 0x3ec   : > { %1573 = vst [vmem:[%s3003_s19 + $0x80] sm:$0xff] %v1326_v53  ;;  %v3074_v60 = vpop.eup %2093  ;;  %339 = vperm.xlu1 %1945, %v315_v57   ;;  %1421 = vmatpush1.bf16.xpose.msra.mxu0 %v1388_v61 }
 0x3ed   : > { %v3078_v36 = vpop.eup %2095  ;;  %1858 = vmatpush1.bf16.xpose.msra.mxu1 %v1388_v61  ;;  %v1220_v33 = vpop.xlane.xlu1 %1219 }
 0x3ee   : > { %v2098_v32 = vpop.eup %2097  ;;  %2103 = vrcp.f32 %v1220_v33  ;;  %v1275_v56 = vadd.f32 %v3078_v36, %v3074_v60 }
 0x3ef   : > { %v1329_v41 = vmul.f32 %v2098_v32, %v2828_v4  ;;  %v1328_v35 = vmul.f32 %v2098_v32, %v2822_v3 }
 0x3f0   : > { %v2100_v49 = vpop.eup %2099  ;;  %369 = vperm.xlu1 %1945, %v321_v1   ;;  %1276 = vadd.xlane.f32.xlu0 %v1275_v56 }
 0x3f1   : > { %v1223_v8 = vpop.xlane.xlu0 %1222  ;;  %v1391_v58 = vpack.c.bf16 %v1329_v41, %v1327_v50  ;;  %1576 = vst [vmem:[%s3003_s19 + $0x98] sm:$0xff] %v1329_v41  ;;  %v1390_v20 = vpack.c.bf16 %v1328_v35, %v1326_v53  ;;  %1575 = vst [vmem:[%s3003_s19 + $0x90] sm:$0xff] %v1328_v35  ;;  %v1331_v29 = vmul.f32 %v2100_v49, %v2839_v9 }
 0x3f2   : > { %v1330_v4 = vmul.f32 %v2100_v49, %v2837_v11  ;;  %2105 = vrcp.f32 %v1223_v8 }
 0x3f3   : > { %1422 = vmatprep.subr.bf16.mxu0 %v1391_v58  ;;  %1843 = vmatprep.subr.bf16.mxu1 %v1391_v58  ;;  %1578 = vst [vmem:[%s3003_s19 + $0xa8] sm:$0xff] %v1331_v29 }
 0x3f4   : > { %1577 = vst [vmem:[%s3003_s19 + $0xa0] sm:$0xff] %v1330_v4  ;;  %v2102_v3 = vpop.eup %2101  ;;  %1423 = vmatpush1.bf16.xpose.msra.mxu0 %v1390_v20 }
 0x3f5   : > { %1859 = vmatpush1.bf16.xpose.msra.mxu1 %v1390_v20  ;;  %v1226_v24 = vpop.xlane.xlu1 %1225  ;;  %v1333_v7 = vmul.f32 %v2102_v3, %v2847_v23  ;;  %v1332_v17 = vmul.f32 %v2102_v3, %v2845_v19  ;;  %v320_v3 = vld [vmem:[%s3371_s2 + $0x40] sm:$0xff] }
 0x3f6   : > { %2107 = vrcp.f32 %v1226_v24 }
 0x3f7   : > { %v1393_v9 = vpack.c.bf16 %v1333_v7, %v1331_v29  ;;  %1580 = vst [vmem:[%s3003_s19 + $0xb8] sm:$0xff] %v1333_v7  ;;  %1579 = vst [vmem:[%s3003_s19 + $0xb0] sm:$0xff] %v1332_v17  ;;  %v1392_v57 = vpack.c.bf16 %v1332_v17, %v1330_v4 }
 0x3f8   : > { %v2104_v11 = vpop.eup %2103 }
 0x3f9   : > { %v1229_v61 = vpop.xlane.xlu0 %1228  ;;  %1424 = vmatprep.subr.bf16.mxu0 %v1393_v9  ;;  %1844 = vmatprep.subr.bf16.mxu1 %v1393_v9  ;;  %v1335_v50 = vmul.f32 %v2104_v11, %v2855_v6  ;;  %v1334_v53 = vmul.f32 %v2104_v11, %v2853_v22 }
 0x3fa   : > { %2109 = vrcp.f32 %v1229_v61 }
 0x3fb   : > { %1582 = vst [vmem:[%s3003_s19 + $0xc8] sm:$0xff] %v1335_v50  ;;  %1581 = vst [vmem:[%s3003_s19 + $0xc0] sm:$0xff] %v1334_v53 }
 0x3fc   : > { %v2106_v23 = vpop.eup %2105  ;;  %1425 = vmatpush1.bf16.xpose.msra.mxu0 %v1392_v57 }
 0x3fd   : > { %1860 = vmatpush1.bf16.xpose.msra.mxu1 %v1392_v57  ;;  %v1232_v19 = vpop.xlane.xlu1 %1231  ;;  %v1337_v33 = vmul.f32 %v2106_v23, %v2863_v10  ;;  %v1336_v1 = vmul.f32 %v2106_v23, %v2861_v25  ;;  %v317_v25 = vld [vmem:[%s3371_s2 + $0x28] sm:$0xff] }
 0x3fe   : > { %2111 = vrcp.f32 %v1232_v19 }
 0x3ff   : > { %v1395_v32 = vpack.c.bf16 %v1337_v33, %v1335_v50  ;;  %1584 = vst [vmem:[%s3003_s19 + $0xd8] sm:$0xff] %v1337_v33  ;;  %1583 = vst [vmem:[%s3003_s19 + $0xd0] sm:$0xff] %v1336_v1  ;;  %v1394_v56 = vpack.c.bf16 %v1336_v1, %v1334_v53 }
 0x400   : > { %v2108_v6 = vpop.eup %2107 }
 0x401   : > { %v1235_v22 = vpop.xlane.xlu0 %1234  ;;  %1426 = vmatprep.subr.bf16.mxu0 %v1395_v32  ;;  %1845 = vmatprep.subr.bf16.mxu1 %v1395_v32  ;;  %v1339_v41 = vmul.f32 %v2108_v6, %v2871_v12  ;;  %v1338_v35 = vmul.f32 %v2108_v6, %v2869_v28  ;;  %v314_v28 = vld [vmem:[%s3371_s2 + $0x10] sm:$0xff]  ;;  %v3454_v6 = vld [vmem:[#allocation16_spill] sm:$0xff] }
 0x402   : > { %2113 = vrcp.f32 %v1235_v22  ;;  %v3455_v22 = vld [vmem:[#allocation15_spill] sm:$0xff] }
 0x403   : > { %1586 = vst [vmem:[%s3003_s19 + $0xe8] sm:$0xff] %v1339_v41  ;;  %1585 = vst [vmem:[%s3003_s19 + $0xe0] sm:$0xff] %v1338_v35 }
 0x404   : > { %v2110_v10 = vpop.eup %2109  ;;  %1427 = vmatpush1.bf16.xpose.msra.mxu0 %v1394_v56 }
 0x405   : > { %1861 = vmatpush1.bf16.xpose.msra.mxu1 %v1394_v56  ;;  %v1238_v49 = vpop.xlane.xlu1 %1237  ;;  %v1341_v8 = vmul.f32 %v2110_v10, %v2879_v52  ;;  %v1340_v58 = vmul.f32 %v2110_v10, %v2877_v31 }
 0x406   : > { %349 = vperm.xlu0 %1944, %v317_v25   ;;  %2115 = vrcp.f32 %v1238_v49  ;;  %v3456_v49 = vld [vmem:[#allocation17_spill] sm:$0xff] }
 0x407   : > { %v1397_v12 = vpack.c.bf16 %v1341_v8, %v1339_v41  ;;  %1588 = vst [vmem:[%s3003_s19 + $0xf8] sm:$0xff] %v1341_v8  ;;  %1587 = vst [vmem:[%s3003_s19 + $0xf0] sm:$0xff] %v1340_v58  ;;  %v1396_v29 = vpack.c.bf16 %v1340_v58, %v1338_v35 }
 0x408   : > { %v2112_v20 = vpop.eup %2111 }
 0x409   : > { %v1241_v4 = vpop.xlane.xlu0 %1240  ;;  %1428 = vmatprep.subr.bf16.mxu0 %v1397_v12  ;;  %1846 = vmatprep.subr.bf16.mxu1 %v1397_v12  ;;  %v1343_v52 = vmul.f32 %v2112_v20, %v2887_v62  ;;  %v1342_v31 = vmul.f32 %v2112_v20, %v2885_v34  ;;  %v3457_v12 = vld [vmem:[#allocation19_spill] sm:$0xff] }
 0x40a   : > { %334 = vperm.xlu0 %1944, %v314_v28   ;;  %2117 = vrcp.f32 %v1241_v4 }
 0x40b   : > { %1590 = vst [vmem:[%s3003_s19 + $0x108] sm:$0xff] %v1343_v52  ;;  %1589 = vst [vmem:[%s3003_s19 + $0x100] sm:$0xff] %v1342_v31 }
 0x40c   : > { %v2114_v24 = vpop.eup %2113  ;;  %1429 = vmatpush1.bf16.xpose.msra.mxu0 %v1396_v29 }
 0x40d   : > { %1862 = vmatpush1.bf16.xpose.msra.mxu1 %v1396_v29  ;;  %v1244_v7 = vpop.xlane.xlu1 %1243  ;;  %v1345_v17 = vmul.f32 %v2114_v24, %v2895_v13  ;;  %v1344_v62 = vmul.f32 %v2114_v24, %v2893_v37  ;;  %v3458_v29 = vld [vmem:[#allocation18_spill] sm:$0xff]  ;;  %v3459_v24 = vld [vmem:[#allocation21_spill] sm:$0xff] }
 0x40e   : > { %364 = vperm.xlu0 %1944, %v320_v3   ;;  %2119 = vrcp.f32 %v1244_v7 }
 0x40f   : > { %v1399_v34 = vpack.c.bf16 %v1345_v17, %v1343_v52  ;;  %1592 = vst [vmem:[%s3003_s19 + $0x118] sm:$0xff] %v1345_v17  ;;  %1591 = vst [vmem:[%s3003_s19 + $0x110] sm:$0xff] %v1344_v62  ;;  %v1398_v11 = vpack.c.bf16 %v1344_v62, %v1342_v31  ;;  %v3460_v17 = vld [vmem:[#allocation20_spill] sm:$0xff] }
 0x410   : > { %v2116_v9 = vpop.eup %2115 }
 0x411   : > { %v1247_v57 = vpop.xlane.xlu0 %1246  ;;  %1430 = vmatprep.subr.bf16.mxu0 %v1399_v34  ;;  %1847 = vmatprep.subr.bf16.mxu1 %v1399_v34  ;;  %v1347_v61 = vmul.f32 %v2116_v9, %v2903_v15  ;;  %v1346_v50 = vmul.f32 %v2116_v9, %v2901_v40  ;;  %v3461_v9 = vld [vmem:[#allocation23_spill] sm:$0xff] }
 0x412   : > { %2121 = vrcp.f32 %v1247_v57  ;;  %v3462_v57 = vld [vmem:[#allocation22_spill] sm:$0xff] }
 0x413   : > { %1594 = vst [vmem:[%s3003_s19 + $0x128] sm:$0xff] %v1347_v61  ;;  %1593 = vst [vmem:[%s3003_s19 + $0x120] sm:$0xff] %v1346_v50 }
 0x414   : > { %v2118_v37 = vpop.eup %2117  ;;  %1431 = vmatpush1.bf16.xpose.msra.mxu0 %v1398_v11 }
 0x415   : > { %1863 = vmatpush1.bf16.xpose.msra.mxu1 %v1398_v11  ;;  %v1250_v13 = vpop.xlane.xlu1 %1249  ;;  %v1349_v53 = vmul.f32 %v2118_v37, %v2911_v42  ;;  %v1348_v23 = vmul.f32 %v2118_v37, %v2909_v47 }
 0x416   : > { %2123 = vrcp.f32 %v1250_v13 }
 0x417   : > { %v1401_v19 = vpack.c.bf16 %v1349_v53, %v1347_v61  ;;  %1596 = vst [vmem:[%s3003_s19 + $0x138] sm:$0xff] %v1349_v53  ;;  %1595 = vst [vmem:[%s3003_s19 + $0x130] sm:$0xff] %v1348_v23  ;;  %v1400_v33 = vpack.c.bf16 %v1348_v23, %v1346_v50  ;;  %v3463_v53 = vld [vmem:[#allocation29_spill] sm:$0xff] }
 0x418   : > { %v2120_v15 = vpop.eup %2119 }
 0x419   : > { %v1253_v40 = vpop.xlane.xlu0 %1252  ;;  %1432 = vmatprep.subr.bf16.mxu0 %v1401_v19  ;;  %1848 = vmatprep.subr.bf16.mxu1 %v1401_v19  ;;  %v1351_v1 = vmul.f32 %v2120_v15, %v2919_v21  ;;  %v1350_v32 = vmul.f32 %v2120_v15, %v2917_v59  ;;  %v3464_v19 = vld [vmem:[#allocation28_spill] sm:$0xff] }
 0x41a   : > { %2125 = vrcp.f32 %v1253_v40  ;;  %v3465_v40 = vld [vmem:[#allocation31_spill] sm:$0xff] }
 0x41b   : > { %1598 = vst [vmem:[%s3003_s19 + $0x148] sm:$0xff] %v1351_v1  ;;  %1597 = vst [vmem:[%s3003_s19 + $0x140] sm:$0xff] %v1350_v32 }
 0x41c   : > { %v2122_v42 = vpop.eup %2121  ;;  %1433 = vmatpush1.bf16.xpose.msra.mxu0 %v1400_v33 }
 0x41d   : > { %1864 = vmatpush1.bf16.xpose.msra.mxu1 %v1400_v33  ;;  %v1256_v47 = vpop.xlane.xlu1 %1255  ;;  %v1353_v56 = vmul.f32 %v2122_v42, %v3454_v6  ;;  %v1352_v41 = vmul.f32 %v2122_v42, %v3455_v22 }
 0x41e   : > { %2127 = vrcp.f32 %v1256_v47 }
 0x41f   : > { %v1403_v35 = vpack.c.bf16 %v1353_v56, %v1351_v1  ;;  %1600 = vst [vmem:[%s3003_s19 + $0x158] sm:$0xff] %v1353_v56  ;;  %1599 = vst [vmem:[%s3003_s19 + $0x150] sm:$0xff] %v1352_v41  ;;  %v1402_v25 = vpack.c.bf16 %v1352_v41, %v1350_v32  ;;  %v3466_v32 = vld [vmem:[#allocation30_spill] sm:$0xff] }
 0x420   : > { %v2124_v21 = vpop.eup %2123 }
 0x421   : > { %v1259_v59 = vpop.xlane.xlu0 %1258  ;;  %1434 = vmatprep.subr.bf16.mxu0 %v1403_v35  ;;  %1849 = vmatprep.subr.bf16.mxu1 %v1403_v35  ;;  %v1355_v10 = vmul.f32 %v2124_v21, %v2935_v39  ;;  %v1354_v8 = vmul.f32 %v2124_v21, %v3456_v49 }
 0x422   : > { %2129 = vrcp.f32 %v1259_v59 }
 0x423   : > { %1602 = vst [vmem:[%s3003_s19 + $0x168] sm:$0xff] %v1355_v10  ;;  %1601 = vst [vmem:[%s3003_s19 + $0x160] sm:$0xff] %v1354_v8 }
 0x424   : > { %v2126_v58 = vpop.eup %2125  ;;  %1435 = vmatpush1.bf16.xpose.msra.mxu0 %v1402_v25 }
 0x425   : > { %1865 = vmatpush1.bf16.xpose.msra.mxu1 %v1402_v25  ;;  %v1262_v28 = vpop.xlane.xlu1 %1261  ;;  %v1357_v20 = vmul.f32 %v2126_v58, %v3457_v12  ;;  %v1356_v4 = vmul.f32 %v2126_v58, %v3458_v29 }
 0x426   : > { %2131 = vrcp.f32 %v1262_v28 }
 0x427   : > { %v1405_v52 = vpack.c.bf16 %v1357_v20, %v1355_v10  ;;  %1604 = vst [vmem:[%s3003_s19 + $0x178] sm:$0xff] %v1357_v20  ;;  %1603 = vst [vmem:[%s3003_s19 + $0x170] sm:$0xff] %v1356_v4  ;;  %v1404_v31 = vpack.c.bf16 %v1356_v4, %v1354_v8 }
 0x428   : > { %v2128_v39 = vpop.eup %2127 }
 0x429   : > { %v1265_v3 = vpop.xlane.xlu0 %1264  ;;  %1436 = vmatprep.subr.bf16.mxu0 %v1405_v52  ;;  %1850 = vmatprep.subr.bf16.mxu1 %v1405_v52  ;;  %v1359_v7 = vmul.f32 %v2128_v39, %v3459_v24  ;;  %v1358_v62 = vmul.f32 %v2128_v39, %v3460_v17  ;;  %v345_v56 = vpop.permute.xlu1 %344 }
 0x42a   : > { %2133 = vrcp.f32 %v1265_v3 }
 0x42b   : > { %1606 = vst [vmem:[%s3003_s19 + $0x188] sm:$0xff] %v1359_v7  ;;  %1605 = vst [vmem:[%s3003_s19 + $0x180] sm:$0xff] %v1358_v62 }
 0x42c   : > { %v2130_v34 = vpop.eup %2129  ;;  %1437 = vmatpush1.bf16.xpose.msra.mxu0 %v1404_v31 }
 0x42d   : > { %1866 = vmatpush1.bf16.xpose.msra.mxu1 %v1404_v31  ;;  %v1361_v11 = vmul.f32 %v2130_v34, %v3461_v9  ;;  %v1360_v61 = vmul.f32 %v2130_v34, %v3462_v57 }
 0x42f   : > { %v1407_v50 = vpack.c.bf16 %v1361_v11, %v1359_v7  ;;  %1608 = vst [vmem:[%s3003_s19 + $0x198] sm:$0xff] %v1361_v11  ;;  %1607 = vst [vmem:[%s3003_s19 + $0x190] sm:$0xff] %v1360_v61  ;;  %v1406_v13 = vpack.c.bf16 %v1360_v61, %v1358_v62  ;;  %v3467_v11 = vld [vmem:[#allocation26_spill] sm:$0xff] }
 0x430   : > { %v2132_v37 = vpop.eup %2131 }
 0x431   : > { %1438 = vmatprep.subr.bf16.mxu0 %v1407_v50  ;;  %1851 = vmatprep.subr.bf16.mxu1 %v1407_v50  ;;  %v1363_v23 = vmul.f32 %v2132_v37, %v3463_v53  ;;  %v1362_v15 = vmul.f32 %v2132_v37, %v3464_v19 }
 0x433   : > { %1610 = vst [vmem:[%s3003_s19 + $0x1a8] sm:$0xff] %v1363_v23  ;;  %1609 = vst [vmem:[%s3003_s19 + $0x1a0] sm:$0xff] %v1362_v15 }
 0x434   : > { %v2134_v33 = vpop.eup %2133  ;;  %1439 = vmatpush1.bf16.xpose.msra.mxu0 %v1406_v13 }
 0x435   : > { %1867 = vmatpush1.bf16.xpose.msra.mxu1 %v1406_v13  ;;  %v1365_v1 = vmul.f32 %v2134_v33, %v3465_v40  ;;  %v1364_v42 = vmul.f32 %v2134_v33, %v3466_v32 }
 0x437   : > { %v1409_v47 = vpack.c.bf16 %v1365_v1, %v1363_v23  ;;  %1612 = vst [vmem:[%s3003_s19 + $0x1b8] sm:$0xff] %v1365_v1  ;;  %1611 = vst [vmem:[%s3003_s19 + $0x1b0] sm:$0xff] %v1364_v42  ;;  %v1408_v6 = vpack.c.bf16 %v1364_v42, %v1362_v15 }
 0x439   : > { %1440 = vmatprep.subr.bf16.mxu0 %v1409_v47  ;;  %1852 = vmatprep.subr.bf16.mxu1 %v1409_v47 }
 0x43c   : > { %1441 = vmatpush1.bf16.xpose.msra.mxu0 %v1408_v6 }
 0x43d   : > { %1868 = vmatpush1.bf16.xpose.msra.mxu1 %v1408_v6 }
 0x45a   : > { %v1268_v22 = vpop.xlane.xlu1 %1267 }
 0x45b   : > { %2135 = vrcp.f32 %v1268_v22 }
 0x45f   : > { %v1274_v41 = vpop.xlane.xlu1 %1273 }
 0x460   : > { %2137 = vrcp.f32 %v1274_v41 }
 0x463   : > { %v355_v35 = vpop.permute.xlu1 %354 }
 0x464   : > { %v3179_v49 = vadd.f32 %v3044_v55, %v355_v35  ;;  %v3182_v8 = vadd.f32 %v3048_v5, %v355_v35 }
 0x465   : > { %v2136_v21 = vpop.eup %2135 }
 0x466   : > { %v1367_v25 = vmul.f32 %v2136_v21, %v2995_v38  ;;  %v1366_v59 = vmul.f32 %v2136_v21, %v2993_v16 }
 0x467   : > { %v360_v10 = vpop.permute.xlu1 %359 }
 0x468   : > { %v3185_v58 = vadd.f32 %v3055_v48, %v360_v10  ;;  %v3188_v28 = vadd.f32 %v3059_v27, %v360_v10  ;;  %1614 = vst [vmem:[%s3003_s19 + $0x1c8] sm:$0xff] %v1367_v25  ;;  %1613 = vst [vmem:[%s3003_s19 + $0x1c0] sm:$0xff] %v1366_v59 }
 0x46a   : > { %v2138_v12 = vpop.eup %2137  ;;  %v606_v16 = vpack.c.bf16 %v3185_v58, %v3179_v49  ;;  %v607_v38 = vpack.c.bf16 %v3188_v28, %v3182_v8 }
 0x46b   : > { %v1371_v55 = vmul.f32 %v2138_v12, %v3007_v45  ;;  %v1370_v5 = vmul.f32 %v2138_v12, %v2999_v14  ;;  %v340_v31 = vpop.permute.xlu1 %339  ;;  %v468_v45 = vadd.f32 %v2988_v2, %v345_v56  ;;  %v470_v14 = vadd.f32 %v2990_v18, %v345_v56 }
 0x46c   : > { %v462_v9 = vadd.f32 %v2984_v44, %v340_v31  ;;  %v464_v18 = vadd.f32 %v3467_v11, %v340_v31 }
 0x46d   : > { %1618 = vst [vmem:[%s3003_s19 + $0x1e8] sm:$0xff] %v1371_v55  ;;  %1617 = vst [vmem:[%s3003_s19 + $0x1e0] sm:$0xff] %v1370_v5 }
 0x46f   : > { %v370_v57 = vpop.permute.xlu1 %369 }
 0x470   : > { %v494_v44 = vadd.f32 %v3091_v26, %v370_v57 }
 0x475   : > { %v1271_v48 = vpop.xlane.xlu0 %1270 }
 0x476   : > { %2139 = vrcp.f32 %v1271_v48 }
 0x47d   : > { %v1277_v27 = vpop.xlane.xlu0 %1276 }
 0x47e   : > { %2141 = vrcp.f32 %v1277_v27 }
 0x480   : > { %v2140_v20 = vpop.eup %2139 }
 0x481   : > { %v1369_v29 = vmul.f32 %v2140_v20, %v3057_v54  ;;  %v1368_v4 = vmul.f32 %v2140_v20, %v3050_v30 }
 0x483   : > { %v1411_v52 = vpack.c.bf16 %v1369_v29, %v1367_v25  ;;  %1616 = vst [vmem:[%s3003_s19 + $0x1d8] sm:$0xff] %v1369_v29  ;;  %v1410_v39 = vpack.c.bf16 %v1368_v4, %v1366_v59  ;;  %1615 = vst [vmem:[%s3003_s19 + $0x1d0] sm:$0xff] %v1368_v4 }
 0x485   : > { %v350_v3 = vpop.permute.xlu0 %349  ;;  %1442 = vmatprep.subr.bf16.mxu0 %v1411_v52  ;;  %1853 = vmatprep.subr.bf16.mxu1 %v1411_v52 }
 0x486   : > { %v472_v24 = vadd.f32 %v3038_v46, %v350_v3  ;;  %v474_v7 = vadd.f32 %v3042_v43, %v350_v3  ;;  %1443 = vmatpush1.bf16.xpose.msra.mxu0 %v1410_v39  ;;  %1869 = vmatpush1.bf16.xpose.msra.mxu1 %v1410_v39  ;;  %v3468_v46 = vld [vmem:[#allocation24_spill] sm:$0xff]  ;;  %v3469_v43 = vld [vmem:[#allocation25_spill] sm:$0xff] }
 0x488   : > { %v2142_v30 = vpop.eup %2141  ;;  %v604_v54 = vpack.c.bf16 %v472_v24, %v468_v45  ;;  %v605_v17 = vpack.c.bf16 %v474_v7, %v470_v14 }
 0x489   : > { %v335_v62 = vpop.permute.xlu0 %334  ;;  %v1373_v34 = vmul.f32 %v2142_v30, %v3078_v36  ;;  %v1372_v2 = vmul.f32 %v2142_v30, %v3074_v60  ;;  %v492_v36 = vadd.f32 %v3087_v51, %v370_v57 }
 0x48a   : > { %v458_v61 = vadd.f32 %v3468_v46, %v335_v62  ;;  %v460_v50 = vadd.f32 %v3469_v43, %v335_v62  ;;  %1456 = vmatprep.mubr.bf16.mxu1 %v605_v17 }
 0x48b   : > { %v1413_v37 = vpack.c.bf16 %v1373_v34, %v1371_v55  ;;  %1620 = vst [vmem:[%s3003_s19 + $0x1f8] sm:$0xff] %v1373_v34  ;;  %v1412_v13 = vpack.c.bf16 %v1372_v2, %v1370_v5  ;;  %1619 = vst [vmem:[%s3003_s19 + $0x1f0] sm:$0xff] %v1372_v2  ;;  %s2179_s19 = scalar_lea.vmem %s2178_s17, 16384 }
 0x48c   : > { %v602_v53 = vpack.c.bf16 %v462_v9, %v458_v61  ;;  %v603_v23 = vpack.c.bf16 %v464_v18, %v460_v50  ;;  %p2181_p13 = scmp.lt.s32.totalorder %s2179_s19, %s2173_s6 }
 0x48d   : > { %v365_v19 = vpop.permute.xlu0 %364  ;;  %1444 = vmatprep.subr.bf16.mxu0 %v1413_v37  ;;  %1854 = vmatprep.subr.bf16.mxu1 %v1413_v37 }
 0x48e   : > { %v488_v60 = vadd.f32 %v3076_v0, %v365_v19  ;;  %v490_v15 = vadd.f32 %v3083_v63, %v365_v19  ;;  %1445 = vmatpush1.bf16.xpose.msra.mxu0 %v1412_v13  ;;  %1870 = vmatpush1.bf16.xpose.msra.mxu1 %v1412_v13  ;;  %p2182_p2 = por %p2181_p13, %p2180_p6 }
 0x48f   : > { %1446 = vmatprep.mubr.bf16.mxu0 %v603_v23 }
 0x490   : > { %v608_v33 = vpack.c.bf16 %v492_v36, %v488_v60  ;;  %v609_v40 = vpack.c.bf16 %v494_v44, %v490_v15  ;;  %p2183_p5 = pnand %p2182_p2, %p2176_p0 }
 0x495   : > { %1447 = vmatmul.mubr.bf16.vlgmr.msra.gmra.mrb[20].mxu0 %v602_v53  ;;  %1457 = vmatmul.mubr.bf16.vlgmr.msra.gmra.mrb[64].mxu1 %v604_v54 }
 0x496   : > { %1466 = vmatprep.mubr.bf16.mxu1 %v607_v38 }
 0x49d   : > { %1467 = vmatmul.mubr.bf16.gmra.mrb[68].mxu1 %v606_v16 }
 0x49e   : > { %1476 = vmatprep.mubr.bf16.mxu1 %v609_v40 }
 0x4a5   : > { %1477 = vmatmul.mubr.bf16.gmra.mrb[72].mxu1 %v608_v33 }
 0x4a6   : > { %2186 = shalt.err (!%p2183_p5)
}
 0x4a7   : > { %s2187_s18 = scalar_lea.hbm %s3225_s3, 8192  ;;  %s2191_s12 = scalar_lea.hbm %s3374_s5, 16384 }
 0x4a8   : > { %p2188_p4 = scmp.ne.s32.totalorder %s3225_s3, %s2187_s18  ;;  %p2192_p12 = scmp.lt.u32.totalorder %s3225_s3, %s3374_s5 }
 0x4a9   : > { %p2193_p1 = scmp.lt.u32.totalorder %s2191_s12, %s2187_s18  ;;  %p2195_p8 = scmp.lt.u32.totalorder %s2187_s18, %s3225_s3 }
 0x4aa   : > { %p2189_p7 = pnand %p2188_p4, %p3470_p9 }
 0x4ab   : > { %p2194_p3 = por %p2193_p1, %p2192_p12 }
 0x4ac   : > { %p2190_p10 = pneg %p2189_p7 }
 0x4ad   : > { %p2196_p11 = por %p2195_p8, %p2194_p3 }
 0x4af   : > { %p2197_p0 = pnand %p2196_p11, %p2190_p10 }
 0x4b1   : > { %2200 = shalt.err (!%p2197_p0)
}
 0x4b2   : > { %s2294_s6 = smov 256   ;;  %s2295_s15 = smov 16   ;;  %v1491_v51 = vld [vmem:[%s2448_s30] sm:$0xff]  ;;  %v1492_v6 = vld [vmem:[%s2448_s30 + $0x8] sm:$0xff]  ;;  %v1493_v25 = vld [vmem:[%s2448_s30 + $0x10] sm:$0xff] }
 0x4b3   : > { %1874 = dma.vmem_to_hbm [thread:$0]  (%p3470_p9), %s3227_s13, 8192, %s3225_s3, %s1627_s29, %s2294_s6, %s2294_s6, %s2295_s15  }
 0x4b4   : > { %s1507_s17 = sld [smem:[#allocation5]]  ;;  %v1495_v1 = vld [vmem:[%s2448_s30 + $0x20] sm:$0xff]  ;;  %v1496_v22 = vld [vmem:[%s2448_s30 + $0x28] sm:$0xff]  ;;  %v1497_v10 = vld [vmem:[%s2448_s30 + $0x30] sm:$0xff]  ;;  %s3276_s13 = scalar_lea.vmem [#allocation9], %s1792_s28 }
 0x4b5   : > { %v1494_v16 = vld [vmem:[%s2448_s30 + $0x18] sm:$0xff]  ;;  %v1499_v45 = vld [vmem:[%s2448_s30 + $0x40] sm:$0xff]  ;;  %v1500_v24 = vld [vmem:[%s2448_s30 + $0x48] sm:$0xff]  ;;  %s1835_s28 = sshll.u32 %s2279_s23, 11  ;;  %s1642_s3 = sshll.u32 %s3276_s13, 4  ;;  %s3315_s3 = int_to_ptr.vmem [resolvable:$true] %s1642_s3 }
 0x4b6   : > { %v1498_v55 = vld [vmem:[%s2448_s30 + $0x38] sm:$0xff]  ;;  %v1501_v54 = vld [vmem:[%s2448_s30 + $0x50] sm:$0xff]  ;;  %v1503_v61 = vld [vmem:[%s2448_s30 + $0x60] sm:$0xff]  ;;  %s3313_s18 = scalar_lea.hbm %s3373_s4, %s1835_s28  ;;  %s1622_s23 = scalar_lea.sflag [#allocation8], %s2442_s26 }
 0x4b7   : > { %v1502_v2 = vld [vmem:[%s2448_s30 + $0x58] sm:$0xff]  ;;  %v1504_v37 = vld [vmem:[%s2448_s30 + $0x68] sm:$0xff]  ;;  %v1505_v23 = vld [vmem:[%s2448_s30 + $0x70] sm:$0xff]  ;;  %s2296_s11 = smov [#allocation9]  }
 0x4b8   : > { %v1506_v60 = vld [vmem:[%s2448_s30 + $0x78] sm:$0xff]  ;;  %s2201_s30 = scalar_lea.vmem %s3315_s3, 2048  ;;  %s2205_s10 = sshll.u32 %s2296_s11, 4  ;;  %s2206_s10 = int_to_ptr.vmem [resolvable:$false] %s2205_s10 }
 0x4b9   : > { %p2202_p6 = scmp.ne.s32.totalorder %s3315_s3, %s2201_s30  ;;  %s2207_s12 = scalar_lea.vmem %s2206_s10, 4096 }
 0x4ba   : > { %v3256_v0 = vstv %s1507_s17  ;;  %p2208_p5 = scmp.lt.s32.totalorder %s3315_s3, %s2206_s10  ;;  %p2209_p4 = scmp.lt.s32.totalorder %s2207_s12, %s2201_s30 }
 0x4bb   : > { %p2203_p13 = pnand %p2202_p6, %p3470_p9 }
 0x4bc   : > { %p2210_p7 = por %p2209_p4, %p2208_p5 }
 0x4bd   : > { %p2204_p2 = pneg %p2203_p13 }
 0x4bf   : > { %p2211_p10 = pnand %p2210_p7, %p2204_p2 }
 0x568   : > { %v1448_v63 = vpop.f32.mrb[20].mxu0  ;;  %v1458_v26 = vpop.f32.mrb[64].mxu1 }
 0x569   : > { %v1509_v32 = vmul.f32 %v3256_v0, %v1448_v63  ;;  %v1513_v42 = vmul.f32 %v3256_v0, %v1458_v26  ;;  %v1450_v47 = vpop.f32.mrb[21].mxu0  ;;  %v1460_v56 = vpop.f32.mrb[65].mxu1 }
 0x56a   : > { %v1510_v41 = vmul.f32 %v3256_v0, %v1450_v47  ;;  %v1514_v35 = vmul.f32 %v3256_v0, %v1460_v56  ;;  %v1452_v21 = vpop.f32.mrb[22].mxu0  ;;  %v1462_v59 = vpop.f32.mrb[66].mxu1 }
 0x56b   : > { %v1525_v49 = vadd.f32 %v1509_v32, %v1491_v51  ;;  %v1529_v8 = vadd.f32 %v1513_v42, %v1495_v1  ;;  %v1511_v58 = vmul.f32 %v3256_v0, %v1452_v21  ;;  %v1515_v28 = vmul.f32 %v3256_v0, %v1462_v59  ;;  %v1454_v12 = vpop.f32.mrb[23].mxu0  ;;  %v1464_v38 = vpop.f32.mrb[67].mxu1 }
 0x56c   : > { %v1526_v5 = vadd.f32 %v1510_v41, %v1492_v6  ;;  %v1530_v48 = vadd.f32 %v1514_v35, %v1496_v22  ;;  %v1512_v27 = vmul.f32 %v3256_v0, %v1454_v12  ;;  %v1516_v20 = vmul.f32 %v3256_v0, %v1464_v38 }
 0x56d   : > { %1541 = vst [vmem:[%s3276_s13] sm:$0xff] %v1525_v49  ;;  %1545 = vst [vmem:[%s3276_s13 + $0x20] sm:$0xff] %v1529_v8  ;;  %v1527_v29 = vadd.f32 %v1511_v58, %v1493_v25  ;;  %v1531_v4 = vadd.f32 %v1515_v28, %v1497_v10 }
 0x56e   : > { %1542 = vst [vmem:[%s3276_s13 + $0x8] sm:$0xff] %v1526_v5  ;;  %1546 = vst [vmem:[%s3276_s13 + $0x28] sm:$0xff] %v1530_v48  ;;  %v1528_v52 = vadd.f32 %v1512_v27, %v1494_v16  ;;  %v1532_v39 = vadd.f32 %v1516_v20, %v1498_v55 }
 0x56f   : > { %1543 = vst [vmem:[%s3276_s13 + $0x10] sm:$0xff] %v1527_v29  ;;  %1547 = vst [vmem:[%s3276_s13 + $0x30] sm:$0xff] %v1531_v4 }
 0x570   : > { %1544 = vst [vmem:[%s3276_s13 + $0x18] sm:$0xff] %v1528_v52  ;;  %1548 = vst [vmem:[%s3276_s13 + $0x38] sm:$0xff] %v1532_v39  ;;  %v1468_v31 = vpop.f32.mrb[68].mxu1 }
 0x571   : > { %v1517_v3 = vmul.f32 %v3256_v0, %v1468_v31  ;;  %v1470_v14 = vpop.f32.mrb[69].mxu1 }
 0x572   : > { %v1518_v7 = vmul.f32 %v3256_v0, %v1470_v14  ;;  %v1472_v30 = vpop.f32.mrb[70].mxu1 }
 0x573   : > { %v1533_v17 = vadd.f32 %v1517_v3, %v1499_v45  ;;  %v1519_v62 = vmul.f32 %v3256_v0, %v1472_v30  ;;  %v1474_v34 = vpop.f32.mrb[71].mxu1 }
 0x574   : > { %v1534_v9 = vadd.f32 %v1518_v7, %v1500_v24  ;;  %v1520_v11 = vmul.f32 %v3256_v0, %v1474_v34 }
 0x575   : > { %1549 = vst [vmem:[%s3276_s13 + $0x40] sm:$0xff] %v1533_v17  ;;  %v1535_v18 = vadd.f32 %v1519_v62, %v1501_v54 }
 0x576   : > { %1550 = vst [vmem:[%s3276_s13 + $0x48] sm:$0xff] %v1534_v9  ;;  %v1536_v57 = vadd.f32 %v1520_v11, %v1502_v2 }
 0x577   : > { %1551 = vst [vmem:[%s3276_s13 + $0x50] sm:$0xff] %v1535_v18 }
 0x578   : > { %1552 = vst [vmem:[%s3276_s13 + $0x58] sm:$0xff] %v1536_v57  ;;  %v1478_v46 = vpop.f32.mrb[72].mxu1 }
 0x579   : > { %v1521_v43 = vmul.f32 %v3256_v0, %v1478_v46  ;;  %v1480_v50 = vpop.f32.mrb[73].mxu1 }
 0x57a   : > { %v1522_v13 = vmul.f32 %v3256_v0, %v1480_v50  ;;  %v1482_v53 = vpop.f32.mrb[74].mxu1 }
 0x57b   : > { %v1537_v36 = vadd.f32 %v1521_v43, %v1503_v61  ;;  %v1523_v19 = vmul.f32 %v3256_v0, %v1482_v53  ;;  %v1484_v44 = vpop.f32.mrb[75].mxu1 }
 0x57c   : > { %v1538_v15 = vadd.f32 %v1522_v13, %v1504_v37  ;;  %v1524_v33 = vmul.f32 %v3256_v0, %v1484_v44 }
 0x57d   : > { %1553 = vst [vmem:[%s3276_s13 + $0x60] sm:$0xff] %v1537_v36  ;;  %v1539_v40 = vadd.f32 %v1523_v19, %v1505_v23 }
 0x57e   : > { %1554 = vst [vmem:[%s3276_s13 + $0x68] sm:$0xff] %v1538_v15  ;;  %v1540_v63 = vadd.f32 %v1524_v33, %v1506_v60 }
 0x57f   : > { %1555 = vst [vmem:[%s3276_s13 + $0x70] sm:$0xff] %v1539_v40 }
 0x580   : > { %1556 = vst [vmem:[%s3276_s13 + $0x78] sm:$0xff] %v1540_v63 }
 0x581   : > { %2214 = shalt.err (!%p2211_p10)
}
 0x582   : > { %s2215_s14 = scalar_lea.hbm %s3313_s18, 2048  ;;  %s2219_s13 = scalar_lea.hbm %s3373_s4, 4096 }
 0x583   : > { %p2216_p12 = scmp.ne.s32.totalorder %s3313_s18, %s2215_s14  ;;  %p2220_p8 = scmp.lt.u32.totalorder %s3313_s18, %s3373_s4 }
 0x584   : > { %p2221_p11 = scmp.lt.u32.totalorder %s2219_s13, %s2215_s14  ;;  %p2223_p6 = scmp.lt.u32.totalorder %s2215_s14, %s3313_s18 }
 0x585   : > { %p2217_p1 = pnand %p2216_p12, %p3470_p9 }
 0x586   : > { %p2222_p0 = por %p2221_p11, %p2220_p8 }
 0x587   : > { %p2218_p3 = pneg %p2217_p1 }
 0x588   : > { %p2224_p13 = por %p2223_p6, %p2222_p0 }
 0x58a   : > { %p2225_p2 = pnand %p2224_p13, %p2218_p3 }
 0x58c   : > { %2228 = shalt.err (!%p2225_p2)
}
 0x58d   : > { %1873 = dma.vmem_to_hbm [thread:$0]  (%p3470_p9), %s3315_s3, 2048, %s3313_s18, %s1622_s23, %s2294_s6, %s2294_s6, %s2295_s15  }
 0x58e PF: > { %s1676_s19 = sand.u32 1, %s2267_s20   ;;  %p3471_p5 = scmp.ne.s32.totalorder %s3406_s9, 0 }
 0x58f   : > { %p3472_p4 = scmp.ge.s32.totalorder %s2287_s25, 2  ;;  %s1677_s30 = scalar_lea.sflag [#allocation8], %s1676_s19 }
 0x591   : > { %p1882_p7 = pnand %p3472_p4, %p3471_p5 }
 0x593   : > { %2258 = dma.done.wait (!%p1882_p7), %s1677_s30, 2048  }
 0x594   : > { %2260 = vsyncadd (!%p1882_p7), %s1677_s30, 4294965248  ;;  %s1686_s7 = scalar_lea.sflag [#allocation11], %s1676_s19 }
 0x595   : > { %2262 = dma.done.wait (!%p1882_p7), %s1686_s7, 8192  }
 0x596   : > { %2264 = vsyncadd (!%p1882_p7), %s1686_s7, 4294959104  ;;  %s26_s25 = sadd.s32 1, %s2287_s25   ;;  %s3473_s20 = smov %s2271_s21 }
 0x597   : > { %p23_p10 = scmp.ge.s32.totalorder %s26_s25, 4   ;;  %s3474_s21 = smov %s2275_s22 }
 0x598   : > { %s3475_s22 = smov %s2386_s8  ;;  %s3476_s23 = smov %s2283_s24 }
 0x599   : > { %s3477_s24 = smov %s3479_s27  ;;  %25 = sbr.rel (!%p23_p10) target bundleno = 10 (0xa), region = 104 }
 0x5a0   :  { %1691 = vsyncpa [#allocation7], 1 }
 0x5a1   :  { %1693 = vsyncpa [#allocation7 + $0x1], 1 }
 0x5a2   :  { %1694 = vsyncpa [#allocation8], 1 }
 0x5a3   :  { %1696 = vsyncpa [#allocation8 + $0x1], 1 }
 0x5a4   :  { %1697 = vsyncpa [#allocation11], 1 }
 0x5a5   :  { %1699 = vsyncpa [#allocation11 + $0x1], 1 }

</bundles_post_ra>
